<compile_context>
chip_gen: v5e
topology: v5e:2x2
jax: 0.10.0
libtpu: 0.0.40
codegen_flags: <defaults>
</compile_context>

<pallas_src>
import functools

import jax
import jax.numpy as jnp
from jax import lax
from jax.experimental import pallas as pl
from jax.experimental.pallas import tpu as pltpu


def sepconv1d_kernel(x_ref, wdw_ref, gamma_ref, beta_ref, wpw_ref, out_ref,
                     xpad_ref, *, kernel_size, stride, halo, l_dw, l_out, eps):
    n, c_in, l = x_ref.shape
    c_out = out_ref.shape[1]

    # ---- stage x into a zero-filled, halo-padded VMEM scratch ----------------
    # xpad_ref: (C_in, N, lp); x sits at lane offset `halo` = pad + stride so
    # the depthwise conv can be evaluated directly on the l_out-wide
    # (pointwise-padded) output domain, with boundary taps landing on zeros.
    xpad_ref[...] = jnp.zeros_like(xpad_ref)
    xpad_ref[:, :, halo:halo + l] = (
        jnp.transpose(x_ref[...], (1, 0, 2)).astype(jnp.float32))

    # Interior mask over the l_out output columns: 1.0 on the l_dw valid
    # depthwise positions, 0.0 on the two pointwise-padding boundary columns.
    col = lax.broadcasted_iota(jnp.int32, (1, l_out), 1)
    interior = jnp.logical_and(col >= 1, col <= l_dw).astype(jnp.float32)
    count = float(n * l_dw)

    dw = []      # per-channel depthwise output, (N, l_out), boundary cols zero
    scale = []   # per-channel BN scale = gamma / sqrt(var + eps)
    shift = []   # per-channel BN shift = beta - mean * scale
    for c in range(c_in):
        xc = xpad_ref[c]                                   # (N, lp) f32 tile
        # Depthwise conv, taps fully unrolled; output column j corresponds to
        # depthwise position j-1 (the two extra columns land in the zero halo).
        # NOTE: static lane-offset slices; for L spanning many vregs a
        # pltpu.roll-based formulation would avoid a per-tap relayout.
        y = None
        for k in range(kernel_size):
            tap = xc[:, k:k + (l_out - 1) * stride + 1:stride]   # (N, l_out)
            term = tap * wdw_ref[c, k]
            y = term if y is None else y + term
        y = y * interior                 # force the 2 padding columns to zero
        dw.append(y)

        # BatchNorm1d training-mode batch statistics over (N, valid length).
        mean = jnp.sum(y) / count
        var = jnp.sum(interior * (y - mean) ** 2) / count
        sc = gamma_ref[c] * lax.rsqrt(var + eps)
        scale.append(sc)
        shift.append(beta_ref[c] - mean * sc)

    # ---- pointwise 1x1 conv (padding=1, bias=False) with BN folded in --------
    # out[:, o, :] = sum_c (w_pw[o,c]*scale[c]) * dw[c]
    #                + (sum_c w_pw[o,c]*shift[c]) * interior
    # Tiny channel counts -> plain VPU broadcast-FMAs, no MXU pass.
    cols = []
    for o in range(c_out):
        po = None
        bias = None
        for c in range(c_in):
            w_oc = wpw_ref[o, c]
            term = dw[c] * (w_oc * scale[c])
            po = term if po is None else po + term
            b = w_oc * shift[c]
            bias = b if bias is None else bias + b
        cols.append(po + bias * interior)                  # (N, l_out)

    out = jnp.stack(cols, axis=1)                          # (N, C_out, l_out)
    out_ref[...] = out.astype(out_ref.dtype)               # one full-width store


def sepconv1d(x, w_dw, gamma, beta, w_pw, *, kernel_size, stride, eps=1e-5):
    """x: (N, C_in, L); w_dw: (C_in, K); gamma/beta: (C_in,); w_pw: (C_out, C_in)."""
    assert stride < kernel_size
    n, c_in, l = x.shape
    c_out = w_pw.shape[0]
    pad = kernel_size - stride
    l_dw = (l + 2 * pad - kernel_size) // stride + 1
    l_out = l_dw + 2                       # pointwise conv has padding=1
    halo = pad + stride                    # extra `stride` covers pointwise pad
    lp = max((l_out - 1) * stride + kernel_size, halo + l)

    kernel = functools.partial(
        sepconv1d_kernel, kernel_size=kernel_size, stride=stride, halo=halo,
        l_dw=l_dw, l_out=l_out, eps=eps)

    vmem = pl.BlockSpec(memory_space=pltpu.MemorySpace.VMEM)
    smem = pl.BlockSpec(memory_space=pltpu.MemorySpace.SMEM)
    return pl.pallas_call(
        kernel,
        out_shape=jax.ShapeDtypeStruct((n, c_out, l_out), x.dtype),
        in_specs=[vmem, smem, smem, smem, smem],
        out_specs=vmem,
        scratch_shapes=[pltpu.VMEM((c_in, n, lp), jnp.float32)],
    )(x, w_dw.astype(jnp.float32), gamma.astype(jnp.float32),
      beta.astype(jnp.float32), w_pw.astype(jnp.float32))


def ref_sepconv1d(x, w_dw, gamma, beta, w_pw, *, kernel_size, stride, eps=1e-5):
    """Pure-JAX reference mirroring the PyTorch module's forward."""
    pad = kernel_size - stride
    y = lax.conv_general_dilated(
        x, w_dw[:, None, :], window_strides=(stride,), padding=[(pad, pad)],
        dimension_numbers=('NCH', 'OIH', 'NCH'),
        feature_group_count=x.shape[1])
    mean = jnp.mean(y, axis=(0, 2), keepdims=True)
    var = jnp.mean((y - mean) ** 2, axis=(0, 2), keepdims=True)
    y = (y - mean) / jnp.sqrt(var + eps)
    y = y * gamma[None, :, None] + beta[None, :, None]
    y = jnp.pad(y, ((0, 0), (0, 0), (1, 1)))
    return lax.conv_general_dilated(
        y, w_pw[:, :, None], window_strides=(1,), padding=[(0, 0)],
        dimension_numbers=('NCH', 'OIH', 'NCH'))


if __name__ == "__main__":
    # SepConv1d(in_channels=4, out_channels=8, kernel_size=3, stride=1, bias=False)
    in_channels, out_channels, kernel_size, stride = 4, 8, 3, 1
    batch, length = 2, 16

    key = jax.random.PRNGKey(0)
    k1, k2, k3, k4, k5 = jax.random.split(key, 5)
    x = jax.random.normal(k1, (batch, in_channels, length), dtype=jnp.float32)
    # depthwise weight: PyTorch shape (C_in, 1, K) with groups=C_in -> stored as (C_in, K)
    w_dw = 0.5 * jax.random.normal(k2, (in_channels, kernel_size), dtype=jnp.float32)
    gamma = 1.0 + 0.1 * jax.random.normal(k3, (in_channels,), dtype=jnp.float32)
    beta = 0.1 * jax.random.normal(k4, (in_channels,), dtype=jnp.float32)
    # pointwise weight: PyTorch shape (C_out, C_in, 1) -> stored as (C_out, C_in)
    w_pw = 0.5 * jax.random.normal(k5, (out_channels, in_channels), dtype=jnp.float32)

    out = sepconv1d(x, w_dw, gamma, beta, w_pw,
                    kernel_size=kernel_size, stride=stride)
    out = jax.block_until_ready(out)

    ref = ref_sepconv1d(x, w_dw, gamma, beta, w_pw,
                        kernel_size=kernel_size, stride=stride)
    assert out.shape == ref.shape, (out.shape, ref.shape)
    assert jnp.allclose(out, ref, rtol=1e-4, atol=1e-4)
    print("KERNEL_OK")
</pallas_src>

<mosaic_0001>
module attributes {stable_mosaic.version = 11 : i64} {
  func.func @sepconv1d_kernel(%arg0: memref<2x4x16xf32, #tpu.memory_space<vmem>>, %arg1: memref<4x3xf32, #tpu.memory_space<smem>>, %arg2: memref<4xf32, #tpu.memory_space<smem>>, %arg3: memref<4xf32, #tpu.memory_space<smem>>, %arg4: memref<8x4xf32, #tpu.memory_space<smem>>, %arg5: memref<2x8x20xf32, #tpu.memory_space<vmem>>, %arg6: memref<4x2x22xf32, #tpu.memory_space<vmem>>) attributes {dimension_semantics = [], scalar_prefetch = 0 : i64, scratch_operands = 1 : i64, tpu.core_type = #tpu.core_type<tc>} {
    %cst = arith.constant 0.000000e+00 : f32
    %0 = vector.broadcast %cst : f32 to vector<4x2x22xf32>
    %c0 = arith.constant 0 : index
    %c0_0 = arith.constant 0 : index
    %c0_1 = arith.constant 0 : index
    %1 = vector.load %arg6[%c0, %c0_0, %c0_1] : memref<4x2x22xf32, #tpu.memory_space<vmem>>, vector<4x2x22xf32>
    tpu.vector_store %arg6[%c0, %c0_0, %c0_1], %0 {strides = array<i32>} : memref<4x2x22xf32, #tpu.memory_space<vmem>>, vector<4x2x22xf32>,
    %c0_2 = arith.constant 0 : index
    %c0_3 = arith.constant 0 : index
    %c0_4 = arith.constant 0 : index
    %2 = vector.load %arg0[%c0_2, %c0_3, %c0_4] : memref<2x4x16xf32, #tpu.memory_space<vmem>>, vector<2x4x16xf32>
    %3 = tpu.transpose %2, [1, 0, 2] : vector<2x4x16xf32> -> vector<4x2x16xf32>
    %c0_5 = arith.constant 0 : index
    %c0_6 = arith.constant 0 : index
    %c3 = arith.constant 3 : index
    %4 = vector.load %arg6[%c0_5, %c0_6, %c3] : memref<4x2x22xf32, #tpu.memory_space<vmem>>, vector<4x2x16xf32>
    tpu.vector_store %arg6[%c0_5, %c0_6, %c3], %3 {strides = array<i32>} : memref<4x2x22xf32, #tpu.memory_space<vmem>>, vector<4x2x16xf32>,
    %5 = tpu.iota {dimensions = array<i32: 1>} : vector<1x20xi32>
    %c1_i32 = arith.constant 1 : i32
    %6 = vector.broadcast %c1_i32 : i32 to vector<1x20xi32>
    %7 = arith.cmpi sge, %5, %6 : vector<1x20xi32>
    %c18_i32 = arith.constant 18 : i32
    %8 = vector.broadcast %c18_i32 : i32 to vector<1x20xi32>
    %9 = arith.cmpi sle, %5, %8 : vector<1x20xi32>
    %10 = arith.andi %7, %9 : vector<1x20xi1>
    %11 = arith.extui %10 : vector<1x20xi1> to vector<1x20xi32>
    %12 = arith.sitofp %11 : vector<1x20xi32> to vector<1x20xf32>
    %c0_7 = arith.constant 0 : index
    %c0_8 = arith.constant 0 : index
    %c0_9 = arith.constant 0 : index
    %13 = vector.load %arg6[%c0_7, %c0_8, %c0_9] : memref<4x2x22xf32, #tpu.memory_space<vmem>>, vector<1x2x22xf32>
    %14 = vector.shape_cast %13 : vector<1x2x22xf32> to vector<2x22xf32>
    %15 = vector.extract_strided_slice %14 {offsets = [0, 0], sizes = [2, 20], strides = [1, 1]} : vector<2x22xf32> to vector<2x20xf32>
    %c0_10 = arith.constant 0 : index
    %c0_11 = arith.constant 0 : index
    %16 = memref.load %arg1[%c0_10, %c0_11] : memref<4x3xf32, #tpu.memory_space<smem>>
    %17 = vector.broadcast %16 : f32 to vector<2x20xf32>
    %18 = arith.mulf %15, %17 : vector<2x20xf32>
    %19 = vector.extract_strided_slice %14 {offsets = [0, 1], sizes = [2, 20], strides = [1, 1]} : vector<2x22xf32> to vector<2x20xf32>
    %c0_12 = arith.constant 0 : index
    %c1 = arith.constant 1 : index
    %20 = memref.load %arg1[%c0_12, %c1] : memref<4x3xf32, #tpu.memory_space<smem>>
    %21 = vector.broadcast %20 : f32 to vector<2x20xf32>
    %22 = arith.mulf %19, %21 : vector<2x20xf32>
    %23 = arith.addf %18, %22 : vector<2x20xf32>
    %24 = vector.extract_strided_slice %14 {offsets = [0, 2], sizes = [2, 20], strides = [1, 1]} : vector<2x22xf32> to vector<2x20xf32>
    %c0_13 = arith.constant 0 : index
    %c2 = arith.constant 2 : index
    %25 = memref.load %arg1[%c0_13, %c2] : memref<4x3xf32, #tpu.memory_space<smem>>
    %26 = vector.broadcast %25 : f32 to vector<2x20xf32>
    %27 = arith.mulf %24, %26 : vector<2x20xf32>
    %28 = arith.addf %23, %27 : vector<2x20xf32>
    %29 = vector.broadcast %12 : vector<1x20xf32> to vector<2x20xf32>
    %30 = arith.mulf %28, %29 : vector<2x20xf32>
    %31 = vector.shape_cast %30 : vector<2x20xf32> to vector<1x2x20xf32>
    %cst_14 = arith.constant dense<0.000000e+00> : vector<1xf32>
    %32 = vector.multi_reduction <add>, %31, %cst_14 [1, 2] : vector<1x2x20xf32> to vector<1xf32>
    %33 = vector.shape_cast %32 : vector<1xf32> to vector<1x1x1xf32>
    %34 = vector.extract %33[0, 0, 0] : f32 from vector<1x1x1xf32>
    %cst_15 = arith.constant 3.600000e+01 : f32
    %35 = arith.divf %34, %cst_15 : f32
    %36 = vector.broadcast %35 : f32 to vector<2x20xf32>
    %37 = arith.subf %30, %36 : vector<2x20xf32>
    %38 = arith.mulf %37, %37 : vector<2x20xf32>
    %39 = vector.broadcast %12 : vector<1x20xf32> to vector<2x20xf32>
    %40 = arith.mulf %39, %38 : vector<2x20xf32>
    %41 = vector.shape_cast %40 : vector<2x20xf32> to vector<1x2x20xf32>
    %cst_16 = arith.constant dense<0.000000e+00> : vector<1xf32>
    %42 = vector.multi_reduction <add>, %41, %cst_16 [1, 2] : vector<1x2x20xf32> to vector<1xf32>
    %43 = vector.shape_cast %42 : vector<1xf32> to vector<1x1x1xf32>
    %44 = vector.extract %43[0, 0, 0] : f32 from vector<1x1x1xf32>
    %cst_17 = arith.constant 3.600000e+01 : f32
    %45 = arith.divf %44, %cst_17 : f32
    %c0_18 = arith.constant 0 : index
    %46 = memref.load %arg2[%c0_18] : memref<4xf32, #tpu.memory_space<smem>>
    %cst_19 = arith.constant 9.99999974E-6 : f32
    %47 = arith.addf %45, %cst_19 : f32
    %48 = math.rsqrt %47 : f32
    %49 = arith.mulf %46, %48 : f32
    %c0_20 = arith.constant 0 : index
    %50 = memref.load %arg3[%c0_20] : memref<4xf32, #tpu.memory_space<smem>>
    %51 = arith.mulf %35, %49 : f32
    %52 = arith.subf %50, %51 : f32
    %c1_21 = arith.constant 1 : index
    %c0_22 = arith.constant 0 : index
    %c0_23 = arith.constant 0 : index
    %53 = vector.load %arg6[%c1_21, %c0_22, %c0_23] : memref<4x2x22xf32, #tpu.memory_space<vmem>>, vector<1x2x22xf32>
    %54 = vector.shape_cast %53 : vector<1x2x22xf32> to vector<2x22xf32>
    %55 = vector.extract_strided_slice %54 {offsets = [0, 0], sizes = [2, 20], strides = [1, 1]} : vector<2x22xf32> to vector<2x20xf32>
    %c1_24 = arith.constant 1 : index
    %c0_25 = arith.constant 0 : index
    %56 = memref.load %arg1[%c1_24, %c0_25] : memref<4x3xf32, #tpu.memory_space<smem>>
    %57 = vector.broadcast %56 : f32 to vector<2x20xf32>
    %58 = arith.mulf %55, %57 : vector<2x20xf32>
    %59 = vector.extract_strided_slice %54 {offsets = [0, 1], sizes = [2, 20], strides = [1, 1]} : vector<2x22xf32> to vector<2x20xf32>
    %c1_26 = arith.constant 1 : index
    %c1_27 = arith.constant 1 : index
    %60 = memref.load %arg1[%c1_26, %c1_27] : memref<4x3xf32, #tpu.memory_space<smem>>
    %61 = vector.broadcast %60 : f32 to vector<2x20xf32>
    %62 = arith.mulf %59, %61 : vector<2x20xf32>
    %63 = arith.addf %58, %62 : vector<2x20xf32>
    %64 = vector.extract_strided_slice %54 {offsets = [0, 2], sizes = [2, 20], strides = [1, 1]} : vector<2x22xf32> to vector<2x20xf32>
    %c1_28 = arith.constant 1 : index
    %c2_29 = arith.constant 2 : index
    %65 = memref.load %arg1[%c1_28, %c2_29] : memref<4x3xf32, #tpu.memory_space<smem>>
    %66 = vector.broadcast %65 : f32 to vector<2x20xf32>
    %67 = arith.mulf %64, %66 : vector<2x20xf32>
    %68 = arith.addf %63, %67 : vector<2x20xf32>
    %69 = vector.broadcast %12 : vector<1x20xf32> to vector<2x20xf32>
    %70 = arith.mulf %68, %69 : vector<2x20xf32>
    %71 = vector.shape_cast %70 : vector<2x20xf32> to vector<1x2x20xf32>
    %cst_30 = arith.constant dense<0.000000e+00> : vector<1xf32>
    %72 = vector.multi_reduction <add>, %71, %cst_30 [1, 2] : vector<1x2x20xf32> to vector<1xf32>
    %73 = vector.shape_cast %72 : vector<1xf32> to vector<1x1x1xf32>
    %74 = vector.extract %73[0, 0, 0] : f32 from vector<1x1x1xf32>
    %cst_31 = arith.constant 3.600000e+01 : f32
    %75 = arith.divf %74, %cst_31 : f32
    %76 = vector.broadcast %75 : f32 to vector<2x20xf32>
    %77 = arith.subf %70, %76 : vector<2x20xf32>
    %78 = arith.mulf %77, %77 : vector<2x20xf32>
    %79 = vector.broadcast %12 : vector<1x20xf32> to vector<2x20xf32>
    %80 = arith.mulf %79, %78 : vector<2x20xf32>
    %81 = vector.shape_cast %80 : vector<2x20xf32> to vector<1x2x20xf32>
    %cst_32 = arith.constant dense<0.000000e+00> : vector<1xf32>
    %82 = vector.multi_reduction <add>, %81, %cst_32 [1, 2] : vector<1x2x20xf32> to vector<1xf32>
    %83 = vector.shape_cast %82 : vector<1xf32> to vector<1x1x1xf32>
    %84 = vector.extract %83[0, 0, 0] : f32 from vector<1x1x1xf32>
    %cst_33 = arith.constant 3.600000e+01 : f32
    %85 = arith.divf %84, %cst_33 : f32
    %c1_34 = arith.constant 1 : index
    %86 = memref.load %arg2[%c1_34] : memref<4xf32, #tpu.memory_space<smem>>
    %cst_35 = arith.constant 9.99999974E-6 : f32
    %87 = arith.addf %85, %cst_35 : f32
    %88 = math.rsqrt %87 : f32
    %89 = arith.mulf %86, %88 : f32
    %c1_36 = arith.constant 1 : index
    %90 = memref.load %arg3[%c1_36] : memref<4xf32, #tpu.memory_space<smem>>
    %91 = arith.mulf %75, %89 : f32
    %92 = arith.subf %90, %91 : f32
    %c2_37 = arith.constant 2 : index
    %c0_38 = arith.constant 0 : index
    %c0_39 = arith.constant 0 : index
    %93 = vector.load %arg6[%c2_37, %c0_38, %c0_39] : memref<4x2x22xf32, #tpu.memory_space<vmem>>, vector<1x2x22xf32>
    %94 = vector.shape_cast %93 : vector<1x2x22xf32> to vector<2x22xf32>
    %95 = vector.extract_strided_slice %94 {offsets = [0, 0], sizes = [2, 20], strides = [1, 1]} : vector<2x22xf32> to vector<2x20xf32>
    %c2_40 = arith.constant 2 : index
    %c0_41 = arith.constant 0 : index
    %96 = memref.load %arg1[%c2_40, %c0_41] : memref<4x3xf32, #tpu.memory_space<smem>>
    %97 = vector.broadcast %96 : f32 to vector<2x20xf32>
    %98 = arith.mulf %95, %97 : vector<2x20xf32>
    %99 = vector.extract_strided_slice %94 {offsets = [0, 1], sizes = [2, 20], strides = [1, 1]} : vector<2x22xf32> to vector<2x20xf32>
    %c2_42 = arith.constant 2 : index
    %c1_43 = arith.constant 1 : index
    %100 = memref.load %arg1[%c2_42, %c1_43] : memref<4x3xf32, #tpu.memory_space<smem>>
    %101 = vector.broadcast %100 : f32 to vector<2x20xf32>
    %102 = arith.mulf %99, %101 : vector<2x20xf32>
    %103 = arith.addf %98, %102 : vector<2x20xf32>
    %104 = vector.extract_strided_slice %94 {offsets = [0, 2], sizes = [2, 20], strides = [1, 1]} : vector<2x22xf32> to vector<2x20xf32>
    %c2_44 = arith.constant 2 : index
    %c2_45 = arith.constant 2 : index
    %105 = memref.load %arg1[%c2_44, %c2_45] : memref<4x3xf32, #tpu.memory_space<smem>>
    %106 = vector.broadcast %105 : f32 to vector<2x20xf32>
    %107 = arith.mulf %104, %106 : vector<2x20xf32>
    %108 = arith.addf %103, %107 : vector<2x20xf32>
    %109 = vector.broadcast %12 : vector<1x20xf32> to vector<2x20xf32>
    %110 = arith.mulf %108, %109 : vector<2x20xf32>
    %111 = vector.shape_cast %110 : vector<2x20xf32> to vector<1x2x20xf32>
    %cst_46 = arith.constant dense<0.000000e+00> : vector<1xf32>
    %112 = vector.multi_reduction <add>, %111, %cst_46 [1, 2] : vector<1x2x20xf32> to vector<1xf32>
    %113 = vector.shape_cast %112 : vector<1xf32> to vector<1x1x1xf32>
    %114 = vector.extract %113[0, 0, 0] : f32 from vector<1x1x1xf32>
    %cst_47 = arith.constant 3.600000e+01 : f32
    %115 = arith.divf %114, %cst_47 : f32
    %116 = vector.broadcast %115 : f32 to vector<2x20xf32>
    %117 = arith.subf %110, %116 : vector<2x20xf32>
    %118 = arith.mulf %117, %117 : vector<2x20xf32>
    %119 = vector.broadcast %12 : vector<1x20xf32> to vector<2x20xf32>
    %120 = arith.mulf %119, %118 : vector<2x20xf32>
    %121 = vector.shape_cast %120 : vector<2x20xf32> to vector<1x2x20xf32>
    %cst_48 = arith.constant dense<0.000000e+00> : vector<1xf32>
    %122 = vector.multi_reduction <add>, %121, %cst_48 [1, 2] : vector<1x2x20xf32> to vector<1xf32>
    %123 = vector.shape_cast %122 : vector<1xf32> to vector<1x1x1xf32>
    %124 = vector.extract %123[0, 0, 0] : f32 from vector<1x1x1xf32>
    %cst_49 = arith.constant 3.600000e+01 : f32
    %125 = arith.divf %124, %cst_49 : f32
    %c2_50 = arith.constant 2 : index
    %126 = memref.load %arg2[%c2_50] : memref<4xf32, #tpu.memory_space<smem>>
    %cst_51 = arith.constant 9.99999974E-6 : f32
    %127 = arith.addf %125, %cst_51 : f32
    %128 = math.rsqrt %127 : f32
    %129 = arith.mulf %126, %128 : f32
    %c2_52 = arith.constant 2 : index
    %130 = memref.load %arg3[%c2_52] : memref<4xf32, #tpu.memory_space<smem>>
    %131 = arith.mulf %115, %129 : f32
    %132 = arith.subf %130, %131 : f32
    %c3_53 = arith.constant 3 : index
    %c0_54 = arith.constant 0 : index
    %c0_55 = arith.constant 0 : index
    %133 = vector.load %arg6[%c3_53, %c0_54, %c0_55] : memref<4x2x22xf32, #tpu.memory_space<vmem>>, vector<1x2x22xf32>
    %134 = vector.shape_cast %133 : vector<1x2x22xf32> to vector<2x22xf32>
    %135 = vector.extract_strided_slice %134 {offsets = [0, 0], sizes = [2, 20], strides = [1, 1]} : vector<2x22xf32> to vector<2x20xf32>
    %c3_56 = arith.constant 3 : index
    %c0_57 = arith.constant 0 : index
    %136 = memref.load %arg1[%c3_56, %c0_57] : memref<4x3xf32, #tpu.memory_space<smem>>
    %137 = vector.broadcast %136 : f32 to vector<2x20xf32>
    %138 = arith.mulf %135, %137 : vector<2x20xf32>
    %139 = vector.extract_strided_slice %134 {offsets = [0, 1], sizes = [2, 20], strides = [1, 1]} : vector<2x22xf32> to vector<2x20xf32>
    %c3_58 = arith.constant 3 : index
    %c1_59 = arith.constant 1 : index
    %140 = memref.load %arg1[%c3_58, %c1_59] : memref<4x3xf32, #tpu.memory_space<smem>>
    %141 = vector.broadcast %140 : f32 to vector<2x20xf32>
    %142 = arith.mulf %139, %141 : vector<2x20xf32>
    %143 = arith.addf %138, %142 : vector<2x20xf32>
    %144 = vector.extract_strided_slice %134 {offsets = [0, 2], sizes = [2, 20], strides = [1, 1]} : vector<2x22xf32> to vector<2x20xf32>
    %c3_60 = arith.constant 3 : index
    %c2_61 = arith.constant 2 : index
    %145 = memref.load %arg1[%c3_60, %c2_61] : memref<4x3xf32, #tpu.memory_space<smem>>
    %146 = vector.broadcast %145 : f32 to vector<2x20xf32>
    %147 = arith.mulf %144, %146 : vector<2x20xf32>
    %148 = arith.addf %143, %147 : vector<2x20xf32>
    %149 = vector.broadcast %12 : vector<1x20xf32> to vector<2x20xf32>
    %150 = arith.mulf %148, %149 : vector<2x20xf32>
    %151 = vector.shape_cast %150 : vector<2x20xf32> to vector<1x2x20xf32>
    %cst_62 = arith.constant dense<0.000000e+00> : vector<1xf32>
    %152 = vector.multi_reduction <add>, %151, %cst_62 [1, 2] : vector<1x2x20xf32> to vector<1xf32>
    %153 = vector.shape_cast %152 : vector<1xf32> to vector<1x1x1xf32>
    %154 = vector.extract %153[0, 0, 0] : f32 from vector<1x1x1xf32>
    %cst_63 = arith.constant 3.600000e+01 : f32
    %155 = arith.divf %154, %cst_63 : f32
    %156 = vector.broadcast %155 : f32 to vector<2x20xf32>
    %157 = arith.subf %150, %156 : vector<2x20xf32>
    %158 = arith.mulf %157, %157 : vector<2x20xf32>
    %159 = vector.broadcast %12 : vector<1x20xf32> to vector<2x20xf32>
    %160 = arith.mulf %159, %158 : vector<2x20xf32>
    %161 = vector.shape_cast %160 : vector<2x20xf32> to vector<1x2x20xf32>
    %cst_64 = arith.constant dense<0.000000e+00> : vector<1xf32>
    %162 = vector.multi_reduction <add>, %161, %cst_64 [1, 2] : vector<1x2x20xf32> to vector<1xf32>
    %163 = vector.shape_cast %162 : vector<1xf32> to vector<1x1x1xf32>
    %164 = vector.extract %163[0, 0, 0] : f32 from vector<1x1x1xf32>
    %cst_65 = arith.constant 3.600000e+01 : f32
    %165 = arith.divf %164, %cst_65 : f32
    %c3_66 = arith.constant 3 : index
    %166 = memref.load %arg2[%c3_66] : memref<4xf32, #tpu.memory_space<smem>>
    %cst_67 = arith.constant 9.99999974E-6 : f32
    %167 = arith.addf %165, %cst_67 : f32
    %168 = math.rsqrt %167 : f32
    %169 = arith.mulf %166, %168 : f32
    %c3_68 = arith.constant 3 : index
    %170 = memref.load %arg3[%c3_68] : memref<4xf32, #tpu.memory_space<smem>>
    %171 = arith.mulf %155, %169 : f32
    %172 = arith.subf %170, %171 : f32
    %c0_69 = arith.constant 0 : index
    %c0_70 = arith.constant 0 : index
    %173 = memref.load %arg4[%c0_69, %c0_70] : memref<8x4xf32, #tpu.memory_space<smem>>
    %174 = arith.mulf %173, %49 : f32
    %175 = vector.broadcast %174 : f32 to vector<2x20xf32>
    %176 = arith.mulf %30, %175 : vector<2x20xf32>
    %177 = arith.mulf %173, %52 : f32
    %c0_71 = arith.constant 0 : index
    %c1_72 = arith.constant 1 : index
    %178 = memref.load %arg4[%c0_71, %c1_72] : memref<8x4xf32, #tpu.memory_space<smem>>
    %179 = arith.mulf %178, %89 : f32
    %180 = vector.broadcast %179 : f32 to vector<2x20xf32>
    %181 = arith.mulf %70, %180 : vector<2x20xf32>
    %182 = arith.addf %176, %181 : vector<2x20xf32>
    %183 = arith.mulf %178, %92 : f32
    %184 = arith.addf %177, %183 : f32
    %c0_73 = arith.constant 0 : index
    %c2_74 = arith.constant 2 : index
    %185 = memref.load %arg4[%c0_73, %c2_74] : memref<8x4xf32, #tpu.memory_space<smem>>
    %186 = arith.mulf %185, %129 : f32
    %187 = vector.broadcast %186 : f32 to vector<2x20xf32>
    %188 = arith.mulf %110, %187 : vector<2x20xf32>
    %189 = arith.addf %182, %188 : vector<2x20xf32>
    %190 = arith.mulf %185, %132 : f32
    %191 = arith.addf %184, %190 : f32
    %c0_75 = arith.constant 0 : index
    %c3_76 = arith.constant 3 : index
    %192 = memref.load %arg4[%c0_75, %c3_76] : memref<8x4xf32, #tpu.memory_space<smem>>
    %193 = arith.mulf %192, %169 : f32
    %194 = vector.broadcast %193 : f32 to vector<2x20xf32>
    %195 = arith.mulf %150, %194 : vector<2x20xf32>
    %196 = arith.addf %189, %195 : vector<2x20xf32>
    %197 = arith.mulf %192, %172 : f32
    %198 = arith.addf %191, %197 : f32
    %199 = vector.broadcast %198 : f32 to vector<1x20xf32>
    %200 = arith.mulf %199, %12 : vector<1x20xf32>
    %201 = vector.broadcast %200 : vector<1x20xf32> to vector<2x20xf32>
    %202 = arith.addf %196, %201 : vector<2x20xf32>
    %c1_77 = arith.constant 1 : index
    %c0_78 = arith.constant 0 : index
    %203 = memref.load %arg4[%c1_77, %c0_78] : memref<8x4xf32, #tpu.memory_space<smem>>
    %204 = arith.mulf %203, %49 : f32
    %205 = vector.broadcast %204 : f32 to vector<2x20xf32>
    %206 = arith.mulf %30, %205 : vector<2x20xf32>
    %207 = arith.mulf %203, %52 : f32
    %c1_79 = arith.constant 1 : index
    %c1_80 = arith.constant 1 : index
    %208 = memref.load %arg4[%c1_79, %c1_80] : memref<8x4xf32, #tpu.memory_space<smem>>
    %209 = arith.mulf %208, %89 : f32
    %210 = vector.broadcast %209 : f32 to vector<2x20xf32>
    %211 = arith.mulf %70, %210 : vector<2x20xf32>
    %212 = arith.addf %206, %211 : vector<2x20xf32>
    %213 = arith.mulf %208, %92 : f32
    %214 = arith.addf %207, %213 : f32
    %c1_81 = arith.constant 1 : index
    %c2_82 = arith.constant 2 : index
    %215 = memref.load %arg4[%c1_81, %c2_82] : memref<8x4xf32, #tpu.memory_space<smem>>
    %216 = arith.mulf %215, %129 : f32
    %217 = vector.broadcast %216 : f32 to vector<2x20xf32>
    %218 = arith.mulf %110, %217 : vector<2x20xf32>
    %219 = arith.addf %212, %218 : vector<2x20xf32>
    %220 = arith.mulf %215, %132 : f32
    %221 = arith.addf %214, %220 : f32
    %c1_83 = arith.constant 1 : index
    %c3_84 = arith.constant 3 : index
    %222 = memref.load %arg4[%c1_83, %c3_84] : memref<8x4xf32, #tpu.memory_space<smem>>
    %223 = arith.mulf %222, %169 : f32
    %224 = vector.broadcast %223 : f32 to vector<2x20xf32>
    %225 = arith.mulf %150, %224 : vector<2x20xf32>
    %226 = arith.addf %219, %225 : vector<2x20xf32>
    %227 = arith.mulf %222, %172 : f32
    %228 = arith.addf %221, %227 : f32
    %229 = vector.broadcast %228 : f32 to vector<1x20xf32>
    %230 = arith.mulf %229, %12 : vector<1x20xf32>
    %231 = vector.broadcast %230 : vector<1x20xf32> to vector<2x20xf32>
    %232 = arith.addf %226, %231 : vector<2x20xf32>
    %c2_85 = arith.constant 2 : index
    %c0_86 = arith.constant 0 : index
    %233 = memref.load %arg4[%c2_85, %c0_86] : memref<8x4xf32, #tpu.memory_space<smem>>
    %234 = arith.mulf %233, %49 : f32
    %235 = vector.broadcast %234 : f32 to vector<2x20xf32>
    %236 = arith.mulf %30, %235 : vector<2x20xf32>
    %237 = arith.mulf %233, %52 : f32
    %c2_87 = arith.constant 2 : index
    %c1_88 = arith.constant 1 : index
    %238 = memref.load %arg4[%c2_87, %c1_88] : memref<8x4xf32, #tpu.memory_space<smem>>
    %239 = arith.mulf %238, %89 : f32
    %240 = vector.broadcast %239 : f32 to vector<2x20xf32>
    %241 = arith.mulf %70, %240 : vector<2x20xf32>
    %242 = arith.addf %236, %241 : vector<2x20xf32>
    %243 = arith.mulf %238, %92 : f32
    %244 = arith.addf %237, %243 : f32
    %c2_89 = arith.constant 2 : index
    %c2_90 = arith.constant 2 : index
    %245 = memref.load %arg4[%c2_89, %c2_90] : memref<8x4xf32, #tpu.memory_space<smem>>
    %246 = arith.mulf %245, %129 : f32
    %247 = vector.broadcast %246 : f32 to vector<2x20xf32>
    %248 = arith.mulf %110, %247 : vector<2x20xf32>
    %249 = arith.addf %242, %248 : vector<2x20xf32>
    %250 = arith.mulf %245, %132 : f32
    %251 = arith.addf %244, %250 : f32
    %c2_91 = arith.constant 2 : index
    %c3_92 = arith.constant 3 : index
    %252 = memref.load %arg4[%c2_91, %c3_92] : memref<8x4xf32, #tpu.memory_space<smem>>
    %253 = arith.mulf %252, %169 : f32
    %254 = vector.broadcast %253 : f32 to vector<2x20xf32>
    %255 = arith.mulf %150, %254 : vector<2x20xf32>
    %256 = arith.addf %249, %255 : vector<2x20xf32>
    %257 = arith.mulf %252, %172 : f32
    %258 = arith.addf %251, %257 : f32
    %259 = vector.broadcast %258 : f32 to vector<1x20xf32>
    %260 = arith.mulf %259, %12 : vector<1x20xf32>
    %261 = vector.broadcast %260 : vector<1x20xf32> to vector<2x20xf32>
    %262 = arith.addf %256, %261 : vector<2x20xf32>
    %c3_93 = arith.constant 3 : index
    %c0_94 = arith.constant 0 : index
    %263 = memref.load %arg4[%c3_93, %c0_94] : memref<8x4xf32, #tpu.memory_space<smem>>
    %264 = arith.mulf %263, %49 : f32
    %265 = vector.broadcast %264 : f32 to vector<2x20xf32>
    %266 = arith.mulf %30, %265 : vector<2x20xf32>
    %267 = arith.mulf %263, %52 : f32
    %c3_95 = arith.constant 3 : index
    %c1_96 = arith.constant 1 : index
    %268 = memref.load %arg4[%c3_95, %c1_96] : memref<8x4xf32, #tpu.memory_space<smem>>
    %269 = arith.mulf %268, %89 : f32
    %270 = vector.broadcast %269 : f32 to vector<2x20xf32>
    %271 = arith.mulf %70, %270 : vector<2x20xf32>
    %272 = arith.addf %266, %271 : vector<2x20xf32>
    %273 = arith.mulf %268, %92 : f32
    %274 = arith.addf %267, %273 : f32
    %c3_97 = arith.constant 3 : index
    %c2_98 = arith.constant 2 : index
    %275 = memref.load %arg4[%c3_97, %c2_98] : memref<8x4xf32, #tpu.memory_space<smem>>
    %276 = arith.mulf %275, %129 : f32
    %277 = vector.broadcast %276 : f32 to vector<2x20xf32>
    %278 = arith.mulf %110, %277 : vector<2x20xf32>
    %279 = arith.addf %272, %278 : vector<2x20xf32>
    %280 = arith.mulf %275, %132 : f32
    %281 = arith.addf %274, %280 : f32
    %c3_99 = arith.constant 3 : index
    %c3_100 = arith.constant 3 : index
    %282 = memref.load %arg4[%c3_99, %c3_100] : memref<8x4xf32, #tpu.memory_space<smem>>
    %283 = arith.mulf %282, %169 : f32
    %284 = vector.broadcast %283 : f32 to vector<2x20xf32>
    %285 = arith.mulf %150, %284 : vector<2x20xf32>
    %286 = arith.addf %279, %285 : vector<2x20xf32>
    %287 = arith.mulf %282, %172 : f32
    %288 = arith.addf %281, %287 : f32
    %289 = vector.broadcast %288 : f32 to vector<1x20xf32>
    %290 = arith.mulf %289, %12 : vector<1x20xf32>
    %291 = vector.broadcast %290 : vector<1x20xf32> to vector<2x20xf32>
    %292 = arith.addf %286, %291 : vector<2x20xf32>
    %c4 = arith.constant 4 : index
    %c0_101 = arith.constant 0 : index
    %293 = memref.load %arg4[%c4, %c0_101] : memref<8x4xf32, #tpu.memory_space<smem>>
    %294 = arith.mulf %293, %49 : f32
    %295 = vector.broadcast %294 : f32 to vector<2x20xf32>
    %296 = arith.mulf %30, %295 : vector<2x20xf32>
    %297 = arith.mulf %293, %52 : f32
    %c4_102 = arith.constant 4 : index
    %c1_103 = arith.constant 1 : index
    %298 = memref.load %arg4[%c4_102, %c1_103] : memref<8x4xf32, #tpu.memory_space<smem>>
    %299 = arith.mulf %298, %89 : f32
    %300 = vector.broadcast %299 : f32 to vector<2x20xf32>
    %301 = arith.mulf %70, %300 : vector<2x20xf32>
    %302 = arith.addf %296, %301 : vector<2x20xf32>
    %303 = arith.mulf %298, %92 : f32
    %304 = arith.addf %297, %303 : f32
    %c4_104 = arith.constant 4 : index
    %c2_105 = arith.constant 2 : index
    %305 = memref.load %arg4[%c4_104, %c2_105] : memref<8x4xf32, #tpu.memory_space<smem>>
    %306 = arith.mulf %305, %129 : f32
    %307 = vector.broadcast %306 : f32 to vector<2x20xf32>
    %308 = arith.mulf %110, %307 : vector<2x20xf32>
    %309 = arith.addf %302, %308 : vector<2x20xf32>
    %310 = arith.mulf %305, %132 : f32
    %311 = arith.addf %304, %310 : f32
    %c4_106 = arith.constant 4 : index
    %c3_107 = arith.constant 3 : index
    %312 = memref.load %arg4[%c4_106, %c3_107] : memref<8x4xf32, #tpu.memory_space<smem>>
    %313 = arith.mulf %312, %169 : f32
    %314 = vector.broadcast %313 : f32 to vector<2x20xf32>
    %315 = arith.mulf %150, %314 : vector<2x20xf32>
    %316 = arith.addf %309, %315 : vector<2x20xf32>
    %317 = arith.mulf %312, %172 : f32
    %318 = arith.addf %311, %317 : f32
    %319 = vector.broadcast %318 : f32 to vector<1x20xf32>
    %320 = arith.mulf %319, %12 : vector<1x20xf32>
    %321 = vector.broadcast %320 : vector<1x20xf32> to vector<2x20xf32>
    %322 = arith.addf %316, %321 : vector<2x20xf32>
    %c5 = arith.constant 5 : index
    %c0_108 = arith.constant 0 : index
    %323 = memref.load %arg4[%c5, %c0_108] : memref<8x4xf32, #tpu.memory_space<smem>>
    %324 = arith.mulf %323, %49 : f32
    %325 = vector.broadcast %324 : f32 to vector<2x20xf32>
    %326 = arith.mulf %30, %325 : vector<2x20xf32>
    %327 = arith.mulf %323, %52 : f32
    %c5_109 = arith.constant 5 : index
    %c1_110 = arith.constant 1 : index
    %328 = memref.load %arg4[%c5_109, %c1_110] : memref<8x4xf32, #tpu.memory_space<smem>>
    %329 = arith.mulf %328, %89 : f32
    %330 = vector.broadcast %329 : f32 to vector<2x20xf32>
    %331 = arith.mulf %70, %330 : vector<2x20xf32>
    %332 = arith.addf %326, %331 : vector<2x20xf32>
    %333 = arith.mulf %328, %92 : f32
    %334 = arith.addf %327, %333 : f32
    %c5_111 = arith.constant 5 : index
    %c2_112 = arith.constant 2 : index
    %335 = memref.load %arg4[%c5_111, %c2_112] : memref<8x4xf32, #tpu.memory_space<smem>>
    %336 = arith.mulf %335, %129 : f32
    %337 = vector.broadcast %336 : f32 to vector<2x20xf32>
    %338 = arith.mulf %110, %337 : vector<2x20xf32>
    %339 = arith.addf %332, %338 : vector<2x20xf32>
    %340 = arith.mulf %335, %132 : f32
    %341 = arith.addf %334, %340 : f32
    %c5_113 = arith.constant 5 : index
    %c3_114 = arith.constant 3 : index
    %342 = memref.load %arg4[%c5_113, %c3_114] : memref<8x4xf32, #tpu.memory_space<smem>>
    %343 = arith.mulf %342, %169 : f32
    %344 = vector.broadcast %343 : f32 to vector<2x20xf32>
    %345 = arith.mulf %150, %344 : vector<2x20xf32>
    %346 = arith.addf %339, %345 : vector<2x20xf32>
    %347 = arith.mulf %342, %172 : f32
    %348 = arith.addf %341, %347 : f32
    %349 = vector.broadcast %348 : f32 to vector<1x20xf32>
    %350 = arith.mulf %349, %12 : vector<1x20xf32>
    %351 = vector.broadcast %350 : vector<1x20xf32> to vector<2x20xf32>
    %352 = arith.addf %346, %351 : vector<2x20xf32>
    %c6 = arith.constant 6 : index
    %c0_115 = arith.constant 0 : index
    %353 = memref.load %arg4[%c6, %c0_115] : memref<8x4xf32, #tpu.memory_space<smem>>
    %354 = arith.mulf %353, %49 : f32
    %355 = vector.broadcast %354 : f32 to vector<2x20xf32>
    %356 = arith.mulf %30, %355 : vector<2x20xf32>
    %357 = arith.mulf %353, %52 : f32
    %c6_116 = arith.constant 6 : index
    %c1_117 = arith.constant 1 : index
    %358 = memref.load %arg4[%c6_116, %c1_117] : memref<8x4xf32, #tpu.memory_space<smem>>
    %359 = arith.mulf %358, %89 : f32
    %360 = vector.broadcast %359 : f32 to vector<2x20xf32>
    %361 = arith.mulf %70, %360 : vector<2x20xf32>
    %362 = arith.addf %356, %361 : vector<2x20xf32>
    %363 = arith.mulf %358, %92 : f32
    %364 = arith.addf %357, %363 : f32
    %c6_118 = arith.constant 6 : index
    %c2_119 = arith.constant 2 : index
    %365 = memref.load %arg4[%c6_118, %c2_119] : memref<8x4xf32, #tpu.memory_space<smem>>
    %366 = arith.mulf %365, %129 : f32
    %367 = vector.broadcast %366 : f32 to vector<2x20xf32>
    %368 = arith.mulf %110, %367 : vector<2x20xf32>
    %369 = arith.addf %362, %368 : vector<2x20xf32>
    %370 = arith.mulf %365, %132 : f32
    %371 = arith.addf %364, %370 : f32
    %c6_120 = arith.constant 6 : index
    %c3_121 = arith.constant 3 : index
    %372 = memref.load %arg4[%c6_120, %c3_121] : memref<8x4xf32, #tpu.memory_space<smem>>
    %373 = arith.mulf %372, %169 : f32
    %374 = vector.broadcast %373 : f32 to vector<2x20xf32>
    %375 = arith.mulf %150, %374 : vector<2x20xf32>
    %376 = arith.addf %369, %375 : vector<2x20xf32>
    %377 = arith.mulf %372, %172 : f32
    %378 = arith.addf %371, %377 : f32
    %379 = vector.broadcast %378 : f32 to vector<1x20xf32>
    %380 = arith.mulf %379, %12 : vector<1x20xf32>
    %381 = vector.broadcast %380 : vector<1x20xf32> to vector<2x20xf32>
    %382 = arith.addf %376, %381 : vector<2x20xf32>
    %c7 = arith.constant 7 : index
    %c0_122 = arith.constant 0 : index
    %383 = memref.load %arg4[%c7, %c0_122] : memref<8x4xf32, #tpu.memory_space<smem>>
    %384 = arith.mulf %383, %49 : f32
    %385 = vector.broadcast %384 : f32 to vector<2x20xf32>
    %386 = arith.mulf %30, %385 : vector<2x20xf32>
    %387 = arith.mulf %383, %52 : f32
    %c7_123 = arith.constant 7 : index
    %c1_124 = arith.constant 1 : index
    %388 = memref.load %arg4[%c7_123, %c1_124] : memref<8x4xf32, #tpu.memory_space<smem>>
    %389 = arith.mulf %388, %89 : f32
    %390 = vector.broadcast %389 : f32 to vector<2x20xf32>
    %391 = arith.mulf %70, %390 : vector<2x20xf32>
    %392 = arith.addf %386, %391 : vector<2x20xf32>
    %393 = arith.mulf %388, %92 : f32
    %394 = arith.addf %387, %393 : f32
    %c7_125 = arith.constant 7 : index
    %c2_126 = arith.constant 2 : index
    %395 = memref.load %arg4[%c7_125, %c2_126] : memref<8x4xf32, #tpu.memory_space<smem>>
    %396 = arith.mulf %395, %129 : f32
    %397 = vector.broadcast %396 : f32 to vector<2x20xf32>
    %398 = arith.mulf %110, %397 : vector<2x20xf32>
    %399 = arith.addf %392, %398 : vector<2x20xf32>
    %400 = arith.mulf %395, %132 : f32
    %401 = arith.addf %394, %400 : f32
    %c7_127 = arith.constant 7 : index
    %c3_128 = arith.constant 3 : index
    %402 = memref.load %arg4[%c7_127, %c3_128] : memref<8x4xf32, #tpu.memory_space<smem>>
    %403 = arith.mulf %402, %169 : f32
    %404 = vector.broadcast %403 : f32 to vector<2x20xf32>
    %405 = arith.mulf %150, %404 : vector<2x20xf32>
    %406 = arith.addf %399, %405 : vector<2x20xf32>
    %407 = arith.mulf %402, %172 : f32
    %408 = arith.addf %401, %407 : f32
    %409 = vector.broadcast %408 : f32 to vector<1x20xf32>
    %410 = arith.mulf %409, %12 : vector<1x20xf32>
    %411 = vector.broadcast %410 : vector<1x20xf32> to vector<2x20xf32>
    %412 = arith.addf %406, %411 : vector<2x20xf32>
    %413 = vector.shape_cast %202 : vector<2x20xf32> to vector<2x1x20xf32>
    %414 = vector.shape_cast %232 : vector<2x20xf32> to vector<2x1x20xf32>
    %415 = vector.shape_cast %262 : vector<2x20xf32> to vector<2x1x20xf32>
    %416 = vector.shape_cast %292 : vector<2x20xf32> to vector<2x1x20xf32>
    %417 = vector.shape_cast %322 : vector<2x20xf32> to vector<2x1x20xf32>
    %418 = vector.shape_cast %352 : vector<2x20xf32> to vector<2x1x20xf32>
    %419 = vector.shape_cast %382 : vector<2x20xf32> to vector<2x1x20xf32>
    %420 = vector.shape_cast %412 : vector<2x20xf32> to vector<2x1x20xf32>
    %421 = tpu.concatenate %413, %414, %415, %416, %417, %418, %419, %420 in 1 : vector<2x1x20xf32>, vector<2x1x20xf32>, vector<2x1x20xf32>, vector<2x1x20xf32>, vector<2x1x20xf32>, vector<2x1x20xf32>, vector<2x1x20xf32>, vector<2x1x20xf32> -> vector<2x8x20xf32>
    %c0_129 = arith.constant 0 : index
    %c0_130 = arith.constant 0 : index
    %c0_131 = arith.constant 0 : index
    %422 = vector.load %arg5[%c0_129, %c0_130, %c0_131] : memref<2x8x20xf32, #tpu.memory_space<vmem>>, vector<2x8x20xf32>
    tpu.vector_store %arg5[%c0_129, %c0_130, %c0_131], %421 {strides = array<i32>} : memref<2x8x20xf32, #tpu.memory_space<vmem>>, vector<2x8x20xf32>,
    return
  }
}

</mosaic_0001>

<bundles_post_ra>
// kernel: tpu_custom_call.1
= control target key start
LH: loop header
LB: loop body
LE: loop exit
PB: predicated region body
PF: predicated region fallthrough
CT: control target
= control target key end

     0   :  { %s1525_s0 = inlined_call_operand.vmem [shape: f32[2,4,16], index: 0, kind: input, shape index: {}]   ;;  %s1526_s1 = inlined_call_operand.vmem [shape: f32[4,3], index: 1, kind: input, shape index: {}]   ;;  %s1527_s2 = inlined_call_operand.vmem [shape: f32[4], index: 2, kind: input, shape index: {}]   ;;  %s1528_s3 = inlined_call_operand.vmem [shape: f32[4], index: 3, kind: input, shape index: {}]   ;;  %s1529_s4 = inlined_call_operand.vmem [shape: f32[8,4], index: 4, kind: input, shape index: {}]   ;;  %s1530_s5 = inlined_call_operand.hbm [shape: f32[2,8,20], index: 5, kind: output, shape index: {}]  }
   0x1   :  { %1541 = sst [smem:[#allocation23_spill]] %s1530_s5 }
   0x2   :  { %10 = vsyncpa [#allocation5], 0 }
   0x3   :  { %11 = vsyncpa [#allocation7], 0 }
   0x4   :  { %12 = vsyncpa [#allocation10], 0  ;;  %s30_s20 = sshll.u32 %s1527_s2, 4  ;;  %s31_s20 = int_to_ptr.vmem [resolvable:$true] %s30_s20 }
   0x5   :  { %13 = vsyncpa [#allocation4], 0  ;;  %s21_s23 = sshll.u32 %s1526_s1, 4  ;;  %s959_s24 = smov [#allocation6]   ;;  %s22_s23 = int_to_ptr.vmem [resolvable:$true] %s21_s23 }
   0x6   :  { %33 = dma.vmem_to_smem %s31_s20, 16, %s959_s24, [#allocation7]  }
   0x7   :  { %s960_s25 = smov [#allocation3]   ;;  %s39_s28 = sshll.u32 %s1528_s3, 4  ;;  %s40_s28 = int_to_ptr.vmem [resolvable:$true] %s39_s28 }
   0x8   :  { %24 = dma.vmem_to_smem %s22_s23, 64, %s960_s25, [#allocation5]  }
   0x9   :  { %s48_s2 = sshll.u32 %s1529_s4, 4  ;;  %s961_s6 = smov [#allocation8]   ;;  %s49_s2 = int_to_ptr.vmem [resolvable:$true] %s48_s2 }
   0xa   :  { %42 = dma.vmem_to_smem %s40_s28, 16, %s961_s6, [#allocation7]  }
   0xb   :  { %s962_s7 = smov [#allocation9]  }
   0xc   :  { %51 = dma.vmem_to_smem %s49_s2, 128, %s962_s7, [#allocation10]  }
   0xd   :  { %951 = dma.done.wait [#allocation5], 64  }
   0xe   :  { %952 = vsyncadd [#allocation5], 4294967232 }
   0xf   :  { %953 = dma.done.wait [#allocation7], 32  }
  0x10   :  { %954 = vsyncadd [#allocation7], 4294967264 }
  0x11   :  { %955 = dma.done.wait [#allocation10], 128  }
  0x12   :  { %956 = vsyncadd [#allocation10], 4294967168 }
  0x13   :  { %68 = sfence }
  0x14   :  { %v1017_v0 = vld.sshfl [vmem:[%s1525_s0] sm:$0x33 pattern:$0x76325410]  ;;  %vm85_vm0 = vcmask 1047556   ;;  %s964_s4 = smov 3   ;;  %v122_v23 = vlaneseq }
  0x15   :  { %v1022_v1 = vld.sshfl [vmem:[%s1525_s0 + $0x4] sm:$0x33 pattern:$0x76325410]  ;;  %v963_v3 = vmov 1934713408  }
  0x16   :  { %v84_v2 = vrot.slane %v1022_v1, 4  ;;  %v1025_v4 = vunpack.c.l.s4 %v963_v3  ;;  %vm69_vm1 = vcmask 173056   ;;  %v965_v8 = vmov 0.0   ;;  %s783_s0 = sld [smem:[#allocation3 + $0x2]]  ;;  %s966_s11 = smov 126  }
  0x17   :  { %70 = vst.msk [vmem:[#allocation2] sm:$0x3] %vm69_vm1, %v965_v8  ;;  %vm117_vm2 = vcmask 148504   ;;  %s782_s10 = sld [smem:[#allocation3 + $0x1]]  ;;  %s967_s12 = smov 127   ;;  %v123_v24 = vand.u32 127, %v122_v23 }
  0x18   :  { %v86_v5 = vsel %vm85_vm0, %v84_v2, %v1017_v0  ;;  %v91_v6 = vunpack.c.0.s8 %v1025_v4  ;;  %71 = vst.msk [vmem:[#allocation2 + $0x2] sm:$0x3] %vm69_vm1, %v965_v8  ;;  %s785_s13 = sld [smem:[#allocation3 + $0x81]]  ;;  %vm150_vm6 = vcmask 156672   ;;  %v968_v41 = vmov 36.0  }
  0x19   :  { %72 = vst.msk [vmem:[#allocation2 + $0x4] sm:$0x3] %vm69_vm1, %v965_v8  ;;  %s786_s14 = sld [smem:[#allocation3 + $0x82]]  ;;  %vm124_vm3 = vcmp.ge.s32.totalorder %v123_v24, 1  ;;  %vm125_vm4 = vcmp.le.s32.totalorder %v123_v24, 18  ;;  %869 = vrcp.f32 %v968_v41 }
  0x1a   :  { %v92_v7 = vperm.slane %v86_v5, %v91_v6  ;;  %73 = vst.msk [vmem:[#allocation2 + $0x6] sm:$0x3] %vm69_vm1, %v965_v8  ;;  %s130_s15 = sld [smem:[#allocation3]]  ;;  %vm126_vm5 = vmand %vm124_vm3, %vm125_vm4  ;;  %vm734_vm4 = vcmask 1040384  }
  0x1b   :  { %v1041_v29 = vsel %vm126_vm5, 1.0, %v965_v8  ;;  %s784_s16 = sld [smem:[#allocation3 + $0x80]]  ;;  %v87_v8 = vrot.slane %v1017_v0, 4  ;;  %vm737_vm5 = vcmask 1041408  }
  0x1c   :  { %105 = vrot.lane.b32.xlu0 %v92_v7, %s964_s4  ;;  %v97_v9 = vrot.slane %v92_v7, 4  ;;  %v142_v12 = vstv %s783_s0  ;;  %s791_s23 = sld [smem:[#allocation3 + $0x102]] }
  0x1d   :  { %v134_v13 = vstv %s782_s10  ;;  %s790_s27 = sld [smem:[#allocation3 + $0x101]] }
  0x1e   :  { %v98_v10 = vsel %vm85_vm0, 0.0, %v97_v9  ;;  %v217_v18 = vstv %s785_s13  ;;  %v88_v9 = vsel %vm85_vm0, %v1022_v1, %v87_v8  ;;  %s795_s28 = sld [smem:[#allocation3 + $0x181]] }
  0x1f   :  { %107 = vrot.lane.b32.xlu2 %v98_v10, %s964_s4  ;;  %v225_v21 = vstv %s786_s14  ;;  %v870_v43 = vpop.eup %869  ;;  %v96_v10 = vperm.slane %v88_v9, %v91_v6  ;;  %s789_s29 = sld [smem:[#allocation3 + $0x100]] }
  0x20   :  { %v131_v25 = vstv %s130_s15  ;;  %v162_v44 = vmul.f32 36.0, %v870_v43  ;;  %vm166_vm7 = vweird.f32 %v870_v43  ;;  %s796_s30 = sld [smem:[#allocation3 + $0x182]] }
  0x21   :  { %v214_v34 = vstv %s784_s16  ;;  %s794_s1 = sld [smem:[#allocation3 + $0x180]] }
  0x22   :  { %v163_v45 = vsub.f32 1.0, %v162_v44  ;;  %v307_v23 = vstv %s791_s23  ;;  %s208_s13 = sld [smem:[#allocation8]] }
  0x23   :  { %s1110_s14 = sld [smem:[#allocation9]] }
  0x24   :  { %v164_v49 = vmul.f32 %v870_v43, %v163_v45  ;;  %v381_v44 = vstv %s795_s28  ;;  %s1112_s15 = sld [smem:[#allocation9 + $0x80]] }
  0x25   :  { %s1114_s16 = sld [smem:[#allocation9 + $0x100]] }
  0x26   :  { %v165_v52 = vadd.f32 %v870_v43, %v164_v49  ;;  %s1124_s23 = sld [smem:[#allocation9 + $0x200]] }
  0x27   :  { %s1132_s28 = sld [smem:[#allocation9 + $0x280]] }
  0x28   :  { %v167_v55 = vsel %vm166_vm7, %v870_v43, %v165_v52  ;;  %s793_s5 = sld [smem:[#allocation8 + $0x2]]  ;;  %vm743_vm7 = vcmask 1043456  }
  0x2c   :  { %1542 = sst [smem:[#allocation16_spill]] %s1124_s23 }
  0x2d   :  { %1543 = sst [smem:[#allocation17_spill]] %s1132_s28 }
  0x2e   :  { %s1215_s23 = sld [smem:[#allocation9 + $0x2]] }
  0x79   :  { %v108_v17 = vpop.permute.xlu2 %107 }
  0x7a   :  { %119 = vst.msk [vmem:[#allocation2 + $0x2] sm:$0x3] %vm117_vm2, %v108_v17 }
  0x81   :  { %v212_v19 = vld [vmem:[#allocation2 + $0x2] sm:$0x3] }
  0x82   :  { %v218_v20 = vmul.f32 %v217_v18, %v212_v19  ;;  %v226_v22 = vmul.f32 %v225_v21, %v212_v19  ;;  %v215_v36 = vmul.f32 %v214_v34, %v212_v19 }
  0x8e   :  { %v106_v11 = vpop.permute.xlu0 %105 }
  0x8f   :  { %118 = vst.msk [vmem:[#allocation2] sm:$0x3] %vm117_vm2, %v106_v11 }
  0x96   :  { %v129_v14 = vld [vmem:[#allocation2] sm:$0x3] }
  0x97   :  { %v143_v15 = vmul.f32 %v142_v12, %v129_v14  ;;  %v135_v16 = vmul.f32 %v134_v13, %v129_v14  ;;  %v132_v26 = vmul.f32 %v131_v25, %v129_v14 }
  0x99   :  { %145 = vrot.lane.b32.xlu1 %v143_v15, %s966_s11  ;;  %137 = vrot.lane.b32.xlu0 %v135_v16, %s967_s12 }
  0xa1   :  { %220 = vrot.lane.b32.xlu0 %v218_v20, %s967_s12 }
  0xa9   :  { %228 = vrot.lane.b32.xlu0 %v226_v22, %s966_s11 }
 0x10b   :  { %v138_v27 = vpop.permute.xlu0 %137  ;;  %v146_v30 = vpop.permute.xlu1 %145 }
 0x10c   :  { %v140_v28 = vadd.f32 %v138_v27, %v132_v26 }
 0x10e   :  { %v148_v31 = vadd.f32 %v146_v30, %v140_v28  ;;  %v99_v28 = vrot.slane %v96_v10, 4 }
 0x110   :  { %v1044_v32 = vmul.f32 %v1041_v29, %v148_v31 }
 0x112   :  { %v151_v33 = vsel %vm150_vm6, %v1044_v32, 0.0 }
 0x113   :  { %152 = vadd.xlane.f32.xlu1 %v151_v33  ;;  %v221_v35 = vpop.permute.xlu0 %220  ;;  %v100_v33 = vsel %vm85_vm0, 0.0, %v99_v28 }
 0x114   :  { %v223_v37 = vadd.f32 %v221_v35, %v215_v36  ;;  %v299_v35 = vstv %s790_s27 }
 0x11b   :  { %v229_v38 = vpop.permute.xlu0 %228 }
 0x11c   :  { %v231_v39 = vadd.f32 %v229_v38, %v223_v37 }
 0x11e   :  { %v1049_v40 = vmul.f32 %v1041_v29, %v231_v39 }
 0x120   :  { %v233_v42 = vsel %vm150_vm6, %v1049_v40, 0.0 }
 0x121   :  { %234 = vadd.xlane.f32.xlu0 %v233_v42 }
 0x186   :  { %v153_v46 = vpop.xlane.xlu1 %152 }
 0x187   :  { %v154_v47 = vrot.slane %v153_v46, 4 }
 0x189   :  { %v155_v48 = vadd.f32 %v154_v47, %v153_v46 }
 0x18b   :  { %v156_v50 = vrot.slane %v155_v48, 2 }
 0x18d   :  { %v157_v51 = vadd.f32 %v156_v50, %v155_v48  ;;  %v296_v50 = vstv %s789_s29  ;;  %s1197_s29 = sld [smem:[#allocation9 + $0x381]] }
 0x18f   :  { %v158_v53 = vrot.slane %v157_v51, 1 }
 0x191   :  { %v159_v54 = vadd.f32 %v158_v53, %v157_v51 }
 0x193   :  { %830 = vpush %v159_v54 }
 0x194   :  { %832 = vpush %v167_v55  ;;  %v235_v11 = vpop.xlane.xlu0 %234 }
 0x195   :  { %v236_v12 = vrot.slane %v235_v11, 4 }
 0x197   :  { %v237_v14 = vadd.f32 %v236_v12, %v235_v11 }
 0x199   :  { %v238_v15 = vrot.slane %v237_v14, 2 }
 0x19b   :  { %v239_v18 = vadd.f32 %v238_v15, %v237_v14  ;;  %v378_v14 = vstv %s794_s1  ;;  %s1159_s1 = sld [smem:[#allocation9 + $0x101]] }
 0x19d   :  { %v240_v4 = vrot.slane %v239_v18, 1 }
 0x19f   :  { %v241_v21 = vadd.f32 %v240_v4, %v239_v18 }
 0x1c4   :  { %s831_s17 = spop %830 }
 0x1c5   :  { %s1053_s18 = spop %832 }
 0x1c6   :  { %s1056_s19 = smul.f32 %s1053_s18, %s831_s17 }
 0x1c8   :  { %v170_v56 = vstv %s1056_s19 }
 0x1c9   :  { %v171_v57 = vsub.f32 %v1044_v32, %v170_v56 }
 0x1cb   :  { %v172_v58 = vmul.f32 %v171_v57, %v171_v57  ;;  %v389_v57 = vstv %s796_s30 }
 0x1cd   :  { %v173_v59 = vmul.f32 %v1041_v29, %v172_v58 }
 0x1cf   :  { %v174_v60 = vsel %vm150_vm6, %v173_v59, 0.0 }
 0x1d0   :  { %175 = vadd.xlane.f32.xlu2 %v174_v60 }
 0x1e8   :  { %109 = vrot.lane.b32.xlu2 %v96_v10, %s964_s4 }
 0x243   :  { %v176_v61 = vpop.xlane.xlu2 %175 }
 0x244   :  { %v177_v62 = vrot.slane %v176_v61, 4 }
 0x246   :  { %v178_v63 = vadd.f32 %v177_v62, %v176_v61 }
 0x248   :  { %v179_v2 = vrot.slane %v178_v63, 2 }
 0x24a   :  { %v180_v3 = vadd.f32 %v179_v2, %v178_v63 }
 0x24b   :  { %v110_v22 = vpop.permute.xlu2 %109 }
 0x24c   :  { %v181_v5 = vrot.slane %v180_v3, 1  ;;  %120 = vst.msk [vmem:[#allocation2 + $0x4] sm:$0x3] %vm117_vm2, %v110_v22 }
 0x24e   :  { %v182_v7 = vadd.f32 %v181_v5, %v180_v3 }
 0x250   :  { %834 = vpush %v182_v7 }
 0x253   :  { %v294_v24 = vld [vmem:[#allocation2 + $0x4] sm:$0x3] }
 0x254   :  { %v308_v25 = vmul.f32 %v307_v23, %v294_v24  ;;  %v300_v36 = vmul.f32 %v299_v35, %v294_v24  ;;  %v297_v51 = vmul.f32 %v296_v50, %v294_v24 }
 0x256   :  { %310 = vrot.lane.b32.xlu2 %v308_v25, %s966_s11 }
 0x25e   :  { %111 = vrot.lane.b32.xlu2 %v100_v33, %s964_s4 }
 0x281   :  { %s835_s20 = spop %834 }
 0x282   :  { %s192_s21 = smul.f32 %s835_s20, %s1053_s18  ;;  %s1118_s20 = sld [smem:[#allocation9 + $0x180]] }
 0x284   :  { %s194_s22 = sadd.f32 1e-05, %s192_s21 }
 0x286   :  { %v195_v13 = vstv %s194_s22 }
 0x287   :  { %871 = vrsqrt.f32 %v195_v13  ;;  %vm202_vm9 = vweird.f32 %v195_v13 }
 0x28d   :  { %v872_v16 = vpop.eup %871 }
 0x28e   :  { %v197_v17 = vmul.f32 %v872_v16, %v195_v13  ;;  %vm203_vm8 = vweird.f32 %v872_v16 }
 0x28f   :  { %vm204_vm10 = vmor %vm202_vm9, %vm203_vm8  ;;  %vm746_vm8 = vcmask 1044480   ;;  %vm749_vm9 = vcmask 1045504  }
 0x290   :  { %v198_v0 = vmul.f32 %v872_v16, %v197_v17 }
 0x292   :  { %v199_v19 = vmul.f32 0.5, %v198_v0 }
 0x294   :  { %v200_v1 = vsub.f32 1.5, %v199_v19 }
 0x296   :  { %v201_v6 = vmul.f32 %v872_v16, %v200_v1 }
 0x298   :  { %v205_v20 = vsel %vm204_vm10, %v872_v16, %v201_v6  ;;  %vm752_vm10 = vcmask 1046528  }
 0x299   :  { %836 = vpush %v205_v20 }
 0x29a   :  { %838 = vpush %v241_v21 }
 0x2b0   :  { %v311_v37 = vpop.permute.xlu2 %310 }
 0x2b8   :  { %v112_v39 = vpop.permute.xlu2 %111 }
 0x2b9   :  { %121 = vst.msk [vmem:[#allocation2 + $0x6] sm:$0x3] %vm117_vm2, %v112_v39 }
 0x2c0   :  { %v376_v46 = vld [vmem:[#allocation2 + $0x6] sm:$0x3] }
 0x2c1   :  { %v382_v48 = vmul.f32 %v381_v44, %v376_v46  ;;  %v390_v58 = vmul.f32 %v389_v57, %v376_v46  ;;  %v379_v15 = vmul.f32 %v378_v14, %v376_v46 }
 0x2c3   :  { %392 = vrot.lane.b32.xlu2 %v390_v58, %s966_s11  ;;  %s193_s11 = sld [smem:[#allocation6]] }
 0x2ca   :  { %s1070_s24 = spop %836 }
 0x2cb   :  { %s839_s25 = spop %838 }
 0x2cc   :  { %s1073_s26 = smul.f32 %s839_s25, %s1053_s18 }
 0x2ce   :  { %v252_v26 = vstv %s1073_s26 }
 0x2cf   :  { %v253_v27 = vsub.f32 %v1049_v40, %v252_v26 }
 0x2d1   :  { %v254_v30 = vmul.f32 %v253_v27, %v253_v27 }
 0x2d3   :  { %v255_v31 = vmul.f32 %v1041_v29, %v254_v30 }
 0x2d5   :  { %v256_v34 = vsel %vm150_vm6, %v255_v31, 0.0 }
 0x2d6   :  { %257 = vadd.xlane.f32.xlu1 %v256_v34 }
 0x2ef   :  { %302 = vrot.lane.b32.xlu1 %v300_v36, %s967_s12 }
 0x2f7   :  { %384 = vrot.lane.b32.xlu1 %v382_v48, %s967_s12  ;;  %s1108_s12 = smul.f32 %s1070_s24, %s193_s11  ;;  %s787_s24 = sld [smem:[#allocation6 + $0x1]] }
 0x2f8   :  { %s1185_s11 = sld [smem:[#allocation9 + $0x281]] }
 0x2f9   :  { %s209_s17 = smul.f32 %s1108_s12, %s1056_s19  ;;  %s1169_s19 = sld [smem:[#allocation9 + $0x181]] }
 0x2fb   :  { %s1120_s21 = ssub.f32 %s208_s13, %s209_s17 }
 0x2fc   :  { %s1155_s13 = sld [smem:[#allocation9 + $0x81]] }
 0x2fd   :  { %s461_s27 = smul.f32 %s1110_s14, %s1120_s21 }
 0x2fe   :  { %1546 = sst [smem:[#allocation20_spill]] %s1185_s11  ;;  %s1550_s28 = smul.f32 %s1114_s16, %s1120_s21 }
 0x31d   :  { %v393_v1 = vpop.permute.xlu2 %392 }
 0x349   :  { %v258_v38 = vpop.xlane.xlu1 %257 }
 0x34a   :  { %v259_v41 = vrot.slane %v258_v38, 4 }
 0x34c   :  { %v260_v42 = vadd.f32 %v259_v41, %v258_v38 }
 0x34e   :  { %v261_v43 = vrot.slane %v260_v42, 2 }
 0x350   :  { %v262_v45 = vadd.f32 %v261_v43, %v260_v42 }
 0x352   :  { %v263_v47 = vrot.slane %v262_v45, 1 }
 0x354   :  { %v264_v49 = vadd.f32 %v263_v47, %v262_v45 }
 0x356   :  { %840 = vpush %v264_v49 }
 0x361   :  { %v303_v52 = vpop.permute.xlu1 %302 }
 0x362   :  { %v305_v53 = vadd.f32 %v303_v52, %v297_v51 }
 0x364   :  { %v313_v54 = vadd.f32 %v311_v37, %v305_v53 }
 0x366   :  { %v1086_v55 = vmul.f32 %v1041_v29, %v313_v54 }
 0x368   :  { %v315_v56 = vsel %vm150_vm6, %v1086_v55, 0.0 }
 0x369   :  { %316 = vadd.xlane.f32.xlu0 %v315_v56  ;;  %v385_v16 = vpop.permute.xlu1 %384 }
 0x36a   :  { %v387_v18 = vadd.f32 %v385_v16, %v379_v15 }
 0x36c   :  { %v395_v6 = vadd.f32 %v393_v1, %v387_v18 }
 0x36e   :  { %v1102_v21 = vmul.f32 %v1041_v29, %v395_v6 }
 0x370   :  { %v397_v22 = vsel %vm150_vm6, %v1102_v21, 0.0 }
 0x387   :  { %s841_s2 = spop %840 }
 0x388   :  { %s274_s6 = smul.f32 %s841_s2, %s1053_s18 }
 0x38a   :  { %s276_s7 = sadd.f32 1e-05, %s274_s6 }
 0x38b   :  { %s1140_s6 = sld [smem:[#allocation9 + $0x300]] }
 0x38c   :  { %v277_v59 = vstv %s276_s7  ;;  %s1179_s7 = sld [smem:[#allocation9 + $0x201]] }
 0x38d   :  { %873 = vrsqrt.f32 %v277_v59  ;;  %vm284_vm12 = vweird.f32 %v277_v59 }
 0x391   :  { %1544 = sst [smem:[#allocation18_spill]] %s1140_s6 }
 0x393   :  { %v874_v60 = vpop.eup %873 }
 0x394   :  { %v279_v61 = vmul.f32 %v874_v60, %v277_v59  ;;  %vm285_vm11 = vweird.f32 %v874_v60 }
 0x395   :  { %vm286_vm13 = vmor %vm284_vm12, %vm285_vm11  ;;  %vm755_vm11 = vcmask 162816  }
 0x396   :  { %v280_v62 = vmul.f32 %v874_v60, %v279_v61 }
 0x398   :  { %v281_v63 = vmul.f32 0.5, %v280_v62 }
 0x39a   :  { %v282_v2 = vsub.f32 1.5, %v281_v63 }
 0x39c   :  { %v283_v3 = vmul.f32 %v874_v60, %v282_v2 }
 0x39e   :  { %v287_v5 = vsel %vm286_vm13, %v874_v60, %v283_v3 }
 0x39f   :  { %842 = vpush %v287_v5 }
 0x3d0   :  { %s1092_s8 = spop %842 }
 0x3dc   :  { %v317_v7 = vpop.xlane.xlu0 %316 }
 0x3dd   :  { %v318_v8 = vrot.slane %v317_v7, 4 }
 0x3df   :  { %v319_v9 = vadd.f32 %v318_v8, %v317_v7 }
 0x3e1   :  { %v320_v10 = vrot.slane %v319_v9, 2 }
 0x3e3   :  { %v321_v11 = vadd.f32 %v320_v10, %v319_v9 }
 0x3e5   :  { %v322_v12 = vrot.slane %v321_v11, 1 }
 0x3e7   :  { %v323_v13 = vadd.f32 %v322_v12, %v321_v11 }
 0x3e9   :  { %844 = vpush %v323_v13 }
 0x41a   :  { %s845_s3 = spop %844 }
 0x41b   :  { %s1095_s9 = smul.f32 %s845_s3, %s1053_s18  ;;  %s1146_s3 = sld [smem:[#allocation9 + $0x380]] }
 0x41d   :  { %v334_v17 = vstv %s1095_s9 }
 0x41e   :  { %v335_v0 = vsub.f32 %v1086_v55, %v334_v17 }
 0x420   :  { %v336_v19 = vmul.f32 %v335_v0, %v335_v0 }
 0x421   :  { %1545 = sst [smem:[#allocation19_spill]] %s1146_s3  ;;  %s1548_s3 = smul.f32 %s1112_s15, %s1120_s21 }
 0x422   :  { %v337_v4 = vmul.f32 %v1041_v29, %v336_v19 }
 0x424   :  { %v338_v20 = vsel %vm150_vm6, %v337_v4, 0.0 }
 0x425   :  { %339 = vadd.xlane.f32.xlu0 %v338_v20 }
 0x42d   :  { %398 = vadd.xlane.f32.xlu0 %v397_v22 }
 0x498   :  { %v340_v23 = vpop.xlane.xlu0 %339 }
 0x499   :  { %v341_v24 = vrot.slane %v340_v23, 4 }
 0x49b   :  { %v342_v25 = vadd.f32 %v341_v24, %v340_v23 }
 0x49d   :  { %v343_v26 = vrot.slane %v342_v25, 2 }
 0x49f   :  { %v344_v27 = vadd.f32 %v343_v26, %v342_v25 }
 0x4a0   :  { %v399_v31 = vpop.xlane.xlu0 %398 }
 0x4a1   :  { %v345_v28 = vrot.slane %v344_v27, 1  ;;  %v400_v33 = vrot.slane %v399_v31, 4 }
 0x4a3   :  { %v346_v30 = vadd.f32 %v345_v28, %v344_v27  ;;  %v401_v35 = vadd.f32 %v400_v33, %v399_v31 }
 0x4a5   :  { %846 = vpush %v346_v30  ;;  %v402_v36 = vrot.slane %v401_v35, 2 }
 0x4a7   :  { %v403_v39 = vadd.f32 %v402_v36, %v401_v35 }
 0x4a9   :  { %v404_v44 = vrot.slane %v403_v39, 1 }
 0x4ab   :  { %v405_v47 = vadd.f32 %v404_v44, %v403_v39 }
 0x4d6   :  { %s847_s4 = spop %846 }
 0x4d7   :  { %s356_s0 = smul.f32 %s847_s4, %s1053_s18 }
 0x4d8   :  { %s1149_s4 = smul.f32 %s1092_s8, %s787_s24  ;;  %s1191_s8 = sld [smem:[#allocation9 + $0x301]] }
 0x4d9   :  { %s358_s10 = sadd.f32 1e-05, %s356_s0 }
 0x4da   :  { %s788_s0 = sld [smem:[#allocation8 + $0x1]]  ;;  %s291_s24 = smul.f32 %s1149_s4, %s1073_s26 }
 0x4db   :  { %v359_v34 = vstv %s358_s10  ;;  %s1151_s10 = sld [smem:[#allocation9 + $0x1]]  ;;  %s492_s2 = smul.f32 %s1155_s13, %s1149_s4 }
 0x4dc   :  { %875 = vrsqrt.f32 %v359_v34  ;;  %vm366_vm15 = vweird.f32 %v359_v34 }
 0x4dd   :  { %v493_v49 = vstv %s492_s2  ;;  %s1554_s2 = smul.f32 %s1114_s16, %s1108_s12 }
 0x4de   :  { %v494_v56 = vmul.f32 %v493_v49, %v1049_v40 }
 0x4df   :  { %v517_v54 = vstv %s1554_s2 }
 0x4e0   :  { %s1173_s25 = ssub.f32 %s788_s0, %s291_s24  ;;  %v518_v62 = vmul.f32 %v517_v54, %v1044_v32 }
 0x4e1   :  { %s463_s26 = smul.f32 %s1151_s10, %s1149_s4 }
 0x4e2   :  { %v876_v37 = vpop.eup %875  ;;  %s467_s0 = smul.f32 %s1151_s10, %s1173_s25  ;;  %s792_s10 = sld [smem:[#allocation6 + $0x2]] }
 0x4e3   :  { %v361_v38 = vmul.f32 %v876_v37, %v359_v34  ;;  %vm367_vm14 = vweird.f32 %v876_v37  ;;  %s496_s24 = smul.f32 %s1155_s13, %s1173_s25  ;;  %v464_v48 = vstv %s463_s26 }
 0x4e4   :  { %vm368_vm0 = vmor %vm366_vm15, %vm367_vm14  ;;  %s525_s22 = smul.f32 %s1159_s1, %s1173_s25  ;;  %s1202_s17 = sadd.f32 %s467_s0, %s461_s27  ;;  %v465_v52 = vmul.f32 %v464_v48, %v1049_v40 }
 0x4e5   :  { %v362_v41 = vmul.f32 %v876_v37, %v361_v38  ;;  %s1211_s6 = sadd.f32 %s496_s24, %s1548_s3  ;;  %s1551_s24 = smul.f32 %s1110_s14, %s1108_s12 }
 0x4e6   :  { %1547 = sst [smem:[#allocation21_spill]] %s1202_s17  ;;  %s1552_s26 = smul.f32 %s1159_s1, %s1149_s4 }
 0x4e7   :  { %v363_v42 = vmul.f32 0.5, %v362_v41  ;;  %1549 = sst [smem:[#allocation22_spill]] %s1211_s6  ;;  %v459_v50 = vstv %s1551_s24  ;;  %s1555_s14 = smul.f32 %s1118_s20, %s1120_s21 }
 0x4e8   :  { %s1219_s27 = sld [smem:[#allocation9 + $0x82]]  ;;  %v522_v51 = vstv %s1552_s26  ;;  %s1556_s1 = smul.f32 %s1169_s19, %s1173_s25  ;;  %v460_v58 = vmul.f32 %v459_v50, %v1044_v32 }
 0x4e9   :  { %v364_v43 = vsub.f32 1.5, %v363_v42  ;;  %s1225_s3 = sld [smem:[#allocation9 + $0x102]]  ;;  %v523_v59 = vmul.f32 %v522_v51, %v1049_v40 }
 0x4ea   :  { %s1232_s6 = sadd.f32 %s525_s22, %s1550_s28  ;;  %s1553_s28 = smul.f32 %s1112_s15, %s1108_s12  ;;  %v466_v2 = vadd.f32 %v465_v52, %v460_v58 }
 0x4eb   :  { %v365_v45 = vmul.f32 %v876_v37, %v364_v43  ;;  %s1557_s24 = sld [smem:[#allocation16_spill]]  ;;  %v524_v13 = vadd.f32 %v523_v59, %v518_v62 }
 0x4ec   :  { %v488_v53 = vstv %s1553_s28  ;;  %s1558_s28 = smul.f32 %s1118_s20, %s1108_s12  ;;  %s1562_s20 = sld [smem:[#allocation22_spill]] }
 0x4ed   :  { %v369_v46 = vsel %vm368_vm0, %v876_v37, %v365_v45  ;;  %v489_v61 = vmul.f32 %v488_v53, %v1044_v32 }
 0x4ee   :  { %848 = vpush %v369_v46  ;;  %v546_v63 = vstv %s1558_s28  ;;  %s1299_s28 = sld [smem:[#allocation9 + $0x302]] }
 0x4ef   :  { %850 = vpush %v405_v47  ;;  %v495_v10 = vadd.f32 %v494_v56, %v489_v61  ;;  %v547_v1 = vmul.f32 %v546_v63, %v1044_v32 }
 0x51f   :  { %s849_s0 = spop %848 }
 0x520   :  { %s1238_s13 = smul.f32 %s849_s0, %s792_s10  ;;  %s851_s17 = spop %850 }
 0x521   :  { %s1247_s22 = smul.f32 %s851_s17, %s1053_s18  ;;  %s1256_s10 = sld [smem:[#allocation9 + $0x182]] }
 0x522   :  { %s373_s0 = smul.f32 %s1238_s13, %s1095_s9  ;;  %s1267_s17 = sadd.f32 %s1556_s1, %s1555_s14 }
 0x523   :  { %v416_v57 = vstv %s1247_s22  ;;  %s470_s15 = smul.f32 %s1215_s23, %s1238_s13  ;;  %s1274_s9 = sld [smem:[#allocation9 + $0x202]] }
 0x524   :  { %s1276_s16 = ssub.f32 %s793_s5, %s373_s0  ;;  %v417_v60 = vsub.f32 %v1102_v21, %v416_v57  ;;  %s499_s26 = smul.f32 %s1219_s27, %s1238_s13 }
 0x525   :  { %v471_v3 = vstv %s470_s15  ;;  %s528_s2 = smul.f32 %s1225_s3, %s1238_s13  ;;  %s1561_s0 = sld [smem:[#allocation21_spill]] }
 0x526   :  { %s1559_s14 = smul.f32 %s1169_s19, %s1149_s4  ;;  %s1294_s1 = sld [smem:[#allocation9 + $0x282]]  ;;  %v418_v8 = vmul.f32 %v417_v60, %v417_v60  ;;  %v472_v9 = vmul.f32 %v471_v3, %v1086_v55  ;;  %v500_v11 = vstv %s499_s26 }
 0x527   :  { %s1560_s5 = smul.f32 %s1557_s24, %s1108_s12  ;;  %v501_v12 = vmul.f32 %v500_v11, %v1086_v55  ;;  %s1563_s19 = sld [smem:[#allocation20_spill]]  ;;  %v529_v14 = vstv %s528_s2 }
 0x528   :  { %v551_v5 = vstv %s1559_s14  ;;  %s474_s11 = smul.f32 %s1215_s23, %s1276_s16  ;;  %s1307_s23 = sld [smem:[#allocation9 + $0x382]]  ;;  %v419_v16 = vmul.f32 %v1041_v29, %v418_v8  ;;  %v1310_v17 = vadd.f32 %v472_v9, %v466_v2  ;;  %v530_v0 = vmul.f32 %v529_v14, %v1086_v55 }
 0x529   :  { %v575_v7 = vstv %s1560_s5  ;;  %s503_s15 = smul.f32 %s1219_s27, %s1276_s16  ;;  %s1565_s26 = sld [smem:[#allocation17_spill]]  ;;  %v552_v18 = vmul.f32 %v551_v5, %v1049_v40  ;;  %v1319_v19 = vadd.f32 %v501_v12, %v495_v10 }
 0x52a   :  { %s1564_s14 = smul.f32 %s1179_s7, %s1149_s4  ;;  %v420_v6 = vsel %vm150_vm6, %v419_v16, 0.0  ;;  %v1331_v20 = vadd.f32 %v530_v0, %v524_v13  ;;  %v576_v25 = vmul.f32 %v575_v7, %v1044_v32  ;;  %vm740_vm6 = vcmask 1042432  }
 0x52b   :  { %s1313_s5 = sadd.f32 %s474_s11, %s1561_s0  ;;  %s532_s27 = smul.f32 %s1225_s3, %s1276_s16  ;;  %421 = vadd.xlane.f32.xlu1 %v420_v6  ;;  %v553_v27 = vadd.f32 %v552_v18, %v547_v1 }
 0x52c   :  { %v580_v15 = vstv %s1564_s14  ;;  %s1322_s2 = sadd.f32 %s503_s15, %s1562_s20  ;;  %s557_s11 = smul.f32 %s1256_s10, %s1238_s13 }
 0x52d   :  { %s1566_s0 = smul.f32 %s1563_s19, %s1149_s4  ;;  %s1567_s3 = sld [smem:[#allocation18_spill]]  ;;  %v581_v22 = vmul.f32 %v580_v15, %v1049_v40 }
 0x52e   :  { %s1334_s14 = sadd.f32 %s532_s27, %s1232_s6  ;;  %s561_s30 = smul.f32 %s1256_s10, %s1276_s16  ;;  %v558_v24 = vstv %s557_s11 }
 0x52f   :  { %v609_v4 = vstv %s1566_s0  ;;  %s1569_s20 = smul.f32 %s1565_s26, %s1108_s12  ;;  %v559_v28 = vmul.f32 %v558_v24, %v1086_v55  ;;  %v582_v37 = vadd.f32 %v581_v22, %v576_v25 }
 0x530   :  { %1568 = sst [smem:[#allocation16_spill]] %s1334_s14  ;;  %s1570_s15 = smul.f32 %s1557_s24, %s1120_s21  ;;  %v610_v30 = vmul.f32 %v609_v4, %v1049_v40 }
 0x531   :  { %v604_v23 = vstv %s1569_s20  ;;  %s1571_s6 = smul.f32 %s1179_s7, %s1173_s25  ;;  %s1356_s20 = sadd.f32 %s561_s30, %s1267_s17  ;;  %v1376_v36 = vadd.f32 %v559_v28, %v553_v27 }
 0x532   :  { %s586_s10 = smul.f32 %s1274_s9, %s1238_s13  ;;  %s1574_s7 = sld [smem:[#allocation19_spill]]  ;;  %v605_v34 = vmul.f32 %v604_v23, %v1044_v32 }
 0x533   :  { %s584_s27 = sadd.f32 %s1571_s6, %s1570_s15  ;;  %s1572_s0 = smul.f32 %s1191_s8, %s1149_s4 }
 0x534   :  { %s590_s14 = smul.f32 %s1274_s9, %s1276_s16  ;;  %v587_v33 = vstv %s586_s10  ;;  %v611_v45 = vadd.f32 %v610_v30, %v605_v34 }
 0x535   :  { %v638_v26 = vstv %s1572_s0  ;;  %s1573_s24 = smul.f32 %s1567_s3, %s1108_s12  ;;  %v588_v38 = vmul.f32 %v587_v33, %v1086_v55 }
 0x536   :  { %s1575_s11 = smul.f32 %s1565_s26, %s1120_s21  ;;  %s1379_s6 = sadd.f32 %s590_s14, %s584_s27  ;;  %v639_v39 = vmul.f32 %v638_v26, %v1049_v40 }
 0x537   :  { %v633_v31 = vstv %s1573_s24  ;;  %s1576_s15 = smul.f32 %s1563_s19, %s1173_s25  ;;  %v1396_v44 = vadd.f32 %v588_v38, %v582_v37 }
 0x538   :  { %s615_s17 = smul.f32 %s1294_s1, %s1238_s13  ;;  %v634_v42 = vmul.f32 %v633_v31, %v1044_v32 }
 0x539   :  { %s613_s30 = sadd.f32 %s1576_s15, %s1575_s11  ;;  %s1577_s9 = smul.f32 %s1197_s29, %s1149_s4 }
 0x53a   :  { %s619_s19 = smul.f32 %s1294_s1, %s1276_s16  ;;  %v616_v41 = vstv %s615_s17  ;;  %v640_v50 = vadd.f32 %v639_v39, %v634_v42 }
 0x53b   :  { %v667_v35 = vstv %s1577_s9  ;;  %s1578_s4 = smul.f32 %s1567_s3, %s1120_s21  ;;  %v617_v46 = vmul.f32 %v616_v41, %v1086_v55  ;;  %s1430_s9 = sld [smem:[#allocation9 + $0x183]] }
 0x53c   :  { %s1579_s26 = smul.f32 %s1191_s8, %s1173_s25  ;;  %s1399_s14 = sadd.f32 %s619_s19, %s613_s30  ;;  %v668_v47 = vmul.f32 %v667_v35, %v1049_v40 }
 0x53d   :  { %s644_s0 = smul.f32 %s1299_s28, %s1238_s13  ;;  %v1412_v49 = vadd.f32 %v617_v46, %v611_v45 }
 0x53e   :  { %s642_s10 = sadd.f32 %s1579_s26, %s1578_s4  ;;  %s1580_s24 = smul.f32 %s1574_s7, %s1108_s12 }
 0x53f   :  { %s648_s1 = smul.f32 %s1299_s28, %s1276_s16  ;;  %v645_v48 = vstv %s644_s0  ;;  %s801_s28 = sld [smem:[#allocation9 + $0x3]] }
 0x540   :  { %v662_v43 = vstv %s1580_s24  ;;  %s1581_s27 = smul.f32 %s1574_s7, %s1120_s21  ;;  %v646_v51 = vmul.f32 %v645_v48, %v1086_v55  ;;  %s798_s7 = sld [smem:[#allocation8 + $0x3]] }
 0x541   :  { %s1582_s3 = smul.f32 %s1197_s29, %s1173_s25  ;;  %s1415_s12 = sadd.f32 %s648_s1, %s642_s10  ;;  %v663_v52 = vmul.f32 %v662_v43, %v1044_v32 }
 0x542   :  { %s673_s11 = smul.f32 %s1307_s23, %s1238_s13  ;;  %v1420_v54 = vadd.f32 %v646_v51, %v640_v50  ;;  %s1435_s26 = sld [smem:[#allocation9 + $0x203]] }
 0x543   :  { %s671_s8 = sadd.f32 %s1582_s3, %s1581_s27  ;;  %s677_s15 = smul.f32 %s1307_s23, %s1276_s16  ;;  %v669_v40 = vadd.f32 %v668_v47, %v663_v52 }
 0x544   :  { %v674_v53 = vstv %s673_s11  ;;  %s797_s16 = sld [smem:[#allocation6 + $0x3]] }
 0x545   :  { %v675_v56 = vmul.f32 %v674_v53, %v1086_v55  ;;  %s1423_s21 = sadd.f32 %s677_s15, %s671_s8 }
 0x546   :  { %s805_s23 = sld [smem:[#allocation9 + $0x83]] }
 0x547   :  { %v1425_v57 = vadd.f32 %v675_v56, %v669_v40  ;;  %s1583_s1 = sld [smem:[#allocation16_spill]] }
 0x548   :  { %s1441_s27 = sld [smem:[#allocation9 + $0x283]] }
 0x549   :  { %s1444_s3 = sld [smem:[#allocation9 + $0x303]] }
 0x54a   :  { %s1448_s11 = sld [smem:[#allocation9 + $0x383]] }
 0x59e   :  { %v422_v58 = vpop.xlane.xlu1 %421 }
 0x59f   :  { %v423_v59 = vrot.slane %v422_v58, 4 }
 0x5a1   :  { %v424_v60 = vadd.f32 %v423_v59, %v422_v58 }
 0x5a3   :  { %v425_v61 = vrot.slane %v424_v60, 2 }
 0x5a5   :  { %v426_v62 = vadd.f32 %v425_v61, %v424_v60 }
 0x5a7   :  { %v427_v63 = vrot.slane %v426_v62, 1 }
 0x5a9   :  { %v428_v2 = vadd.f32 %v427_v63, %v426_v62 }
 0x5ab   :  { %852 = vpush %v428_v2 }
 0x5dc   :  { %s853_s25 = spop %852 }
 0x5dd   :  { %s438_s29 = smul.f32 %s853_s25, %s1053_s18  ;;  %s809_s18 = sld [smem:[#allocation9 + $0x103]] }
 0x5df   :  { %s440_s13 = sadd.f32 1e-05, %s438_s29 }
 0x5e1   :  { %v441_v32 = vstv %s440_s13 }
 0x5e2   :  { %877 = vrsqrt.f32 %v441_v32  ;;  %vm448_vm2 = vweird.f32 %v441_v32 }
 0x5e8   :  { %v878_v3 = vpop.eup %877 }
 0x5e9   :  { %v443_v5 = vmul.f32 %v878_v3, %v441_v32  ;;  %vm449_vm1 = vweird.f32 %v878_v3 }
 0x5ea   :  { %vm450_vm3 = vmor %vm448_vm2, %vm449_vm1 }
 0x5eb   :  { %v444_v55 = vmul.f32 %v878_v3, %v443_v5 }
 0x5ed   :  { %v445_v7 = vmul.f32 0.5, %v444_v55 }
 0x5ef   :  { %v446_v8 = vsub.f32 1.5, %v445_v7 }
 0x5f1   :  { %v447_v9 = vmul.f32 %v878_v3, %v446_v8 }
 0x5f3   :  { %v451_v10 = vsel %vm450_vm3, %v878_v3, %v447_v9 }
 0x5f4   :  { %854 = vpush %v451_v10 }
 0x625   :  { %s855_s30 = spop %854 }
 0x626   :  { %s1428_s17 = smul.f32 %s855_s30, %s797_s16 }
 0x628   :  { %s455_s19 = smul.f32 %s1428_s17, %s1247_s22 }
 0x629   :  { %s477_s4 = smul.f32 %s801_s28, %s1428_s17 }
 0x62a   :  { %s1437_s10 = ssub.f32 %s798_s7, %s455_s19  ;;  %s506_s0 = smul.f32 %s805_s23, %s1428_s17 }
 0x62b   :  { %v478_v11 = vstv %s477_s4  ;;  %s535_s24 = smul.f32 %s809_s18, %s1428_s17 }
 0x62c   :  { %s481_s22 = smul.f32 %s801_s28, %s1437_s10  ;;  %v507_v12 = vstv %s506_s0  ;;  %v479_v13 = vmul.f32 %v478_v11, %v1102_v21  ;;  %s1584_s0 = sld [smem:[#allocation23_spill]] }
 0x62d   :  { %s510_s8 = smul.f32 %s805_s23, %s1437_s10  ;;  %v536_v14 = vstv %s535_s24  ;;  %v508_v15 = vmul.f32 %v507_v12, %v1102_v21 }
 0x62e   :  { %s482_s15 = sadd.f32 %s481_s22, %s1313_s5  ;;  %s539_s25 = smul.f32 %s809_s18, %s1437_s10  ;;  %v537_v16 = vmul.f32 %v536_v14, %v1102_v21  ;;  %v480_v18 = vadd.f32 %v479_v13, %v1310_v17 }
 0x62f   :  { %s511_s29 = sadd.f32 %s510_s8, %s1322_s2  ;;  %s564_s13 = smul.f32 %s1430_s9, %s1428_s17  ;;  %v509_v22 = vadd.f32 %v508_v15, %v1319_v19 }
 0x630   :  { %v483_v0 = vstv %s482_s15  ;;  %s540_s16 = sadd.f32 %s539_s25, %s1583_s1  ;;  %s568_s28 = smul.f32 %s1430_s9, %s1437_s10  ;;  %v538_v26 = vadd.f32 %v537_v16, %v1331_v20 }
 0x631   :  { %v484_v1 = vmul.f32 %v1041_v29, %v483_v0  ;;  %v512_v4 = vstv %s511_s29  ;;  %v565_v6 = vstv %s564_s13  ;;  %s593_s5 = smul.f32 %s1435_s26, %s1428_s17  ;;  %s970_s1 = smov 128  }
 0x632   :  { %v513_v23 = vmul.f32 %v1041_v29, %v512_v4  ;;  %v541_v24 = vstv %s540_s16  ;;  %v566_v25 = vmul.f32 %v565_v6, %v1102_v21  ;;  %s569_s2 = sadd.f32 %s568_s28, %s1356_s20  ;;  %s597_s23 = smul.f32 %s1435_s26, %s1437_s10 }
 0x633   :  { %v1470_v17 = vadd.f32 %v484_v1, %v480_v18  ;;  %v542_v27 = vmul.f32 %v1041_v29, %v541_v24  ;;  %v594_v28 = vstv %s593_s5  ;;  %s622_s7 = smul.f32 %s1441_s27, %s1428_s17  ;;  %s764_s24 = sshll.u32 %s1584_s0, 4  ;;  %s765_s24 = int_to_ptr.hbm [resolvable:$true] %s764_s24 }
 0x634   :  { %v514_v19 = vadd.f32 %v513_v23, %v509_v22  ;;  %v570_v30 = vstv %s569_s2  ;;  %v595_v31 = vmul.f32 %v594_v28, %v1102_v21  ;;  %s598_s18 = sadd.f32 %s597_s23, %s1379_s6  ;;  %s626_s20 = smul.f32 %s1441_s27, %s1437_s10  ;;  %v567_v34 = vadd.f32 %v566_v25, %v1376_v36 }
 0x635   :  { %v543_v33 = vadd.f32 %v542_v27, %v538_v26  ;;  %v571_v20 = vmul.f32 %v1041_v29, %v570_v30  ;;  %v623_v35 = vstv %s622_s7  ;;  %s651_s30 = smul.f32 %s1444_s3, %s1428_s17  ;;  %s971_s27 = smov 8  }
 0x636   :  { %v599_v37 = vstv %s598_s18  ;;  %v624_v38 = vmul.f32 %v623_v35, %v1102_v21  ;;  %s627_s9 = sadd.f32 %s626_s20, %s1399_s14  ;;  %s655_s19 = smul.f32 %s1444_s3, %s1437_s10  ;;  %v596_v41 = vadd.f32 %v595_v31, %v1396_v44  ;;  %v693_v46 = vrot.slane %v514_v19, 1 }
 0x637   :  { %v572_v39 = vadd.f32 %v571_v20, %v567_v34  ;;  %v600_v42 = vmul.f32 %v1041_v29, %v599_v37  ;;  %v652_v36 = vstv %s651_s30  ;;  %s680_s6 = smul.f32 %s1448_s11, %s1428_s17  ;;  %v695_v47 = vrot.slane %v543_v33, 1 }
 0x638   :  { %v628_v43 = vstv %s627_s9  ;;  %v653_v45 = vmul.f32 %v652_v36, %v1102_v21  ;;  %s656_s4 = sadd.f32 %s655_s19, %s1415_s12  ;;  %s684_s26 = smul.f32 %s1448_s11, %s1437_s10  ;;  %v625_v50 = vadd.f32 %v624_v38, %v1412_v49  ;;  %v706_v40 = vperm.slane %v514_v19, 0 }
 0x639   :  { %v601_v48 = vadd.f32 %v600_v42, %v596_v41  ;;  %v629_v51 = vmul.f32 %v1041_v29, %v628_v43  ;;  %v681_v44 = vstv %s680_s6  ;;  %v697_v60 = vrot.slane %v572_v39, 1  ;;  %s969_s12 = smov [#allocation11]  }
 0x63a   :  { %v657_v52 = vstv %s656_s4  ;;  %v682_v53 = vmul.f32 %v681_v44, %v1102_v21  ;;  %s685_s14 = sadd.f32 %s684_s26, %s1423_s21  ;;  %v654_v58 = vadd.f32 %v653_v45, %v1420_v54  ;;  %v707_v63 = vperm.slane %v693_v46, 0  ;;  %s762_s21 = sshll.u32 %s969_s12, 4  ;;  %s763_s21 = int_to_ptr.vmem [resolvable:$true] %s762_s21 }
 0x63b   :  { %v630_v56 = vadd.f32 %v629_v51, %v625_v50  ;;  %v658_v59 = vmul.f32 %v1041_v29, %v657_v52  ;;  %v699_v62 = vrot.slane %v601_v48, 1  ;;  %v710_v2 = vperm.slane %v543_v33, 0 }
 0x63c   :  { %v686_v61 = vstv %s685_s14  ;;  %v683_v32 = vadd.f32 %v682_v53, %v1425_v57  ;;  %v711_v5 = vperm.slane %v695_v47, 0  ;;  %v690_v21 = vrot.slane %v1470_v17, 1 }
 0x63d   :  { %v659_v49 = vadd.f32 %v658_v59, %v654_v58  ;;  %v687_v3 = vmul.f32 %v1041_v29, %v686_v61  ;;  %v701_v55 = vrot.slane %v630_v56, 1  ;;  %v735_v7 = vsel %vm734_vm4, %v1470_v17, %v706_v40 }
 0x63e   :  { %v714_v9 = vperm.slane %v572_v39, 0  ;;  %v715_v10 = vperm.slane %v697_v60, 0  ;;  %v736_v11 = vsel %vm734_vm4, %v690_v21, %v707_v63  ;;  %v738_v57 = vsel %vm737_vm5, %v735_v7, %v710_v2 }
 0x63f   :  { %v688_v54 = vadd.f32 %v687_v3, %v683_v32  ;;  %v703_v8 = vrot.slane %v659_v49, 1  ;;  %v718_v29 = vperm.slane %v601_v48, 0  ;;  %v719_v13 = vperm.slane %v699_v62, 0 }
 0x640   :  { %v739_v14 = vsel %vm737_vm5, %v736_v11, %v711_v5  ;;  %v722_v15 = vperm.slane %v630_v56, 0  ;;  %v723_v16 = vperm.slane %v701_v55, 0  ;;  %v741_v0 = vsel %vm740_vm6, %v738_v57, %v714_v9 }
 0x641   :  { %v705_v12 = vrot.slane %v688_v54, 1  ;;  %v742_v18 = vsel %vm740_vm6, %v739_v14, %v715_v10  ;;  %v726_v1 = vperm.slane %v659_v49, 0  ;;  %v727_v4 = vperm.slane %v703_v8, 0 }
 0x642   :  { %v744_v6 = vsel %vm743_vm7, %v741_v0, %v718_v29  ;;  %v745_v22 = vsel %vm743_vm7, %v742_v18, %v719_v13  ;;  %v730_v23 = vperm.slane %v688_v54, 0 }
 0x643   :  { %v731_v24 = vperm.slane %v705_v12, 0  ;;  %v747_v25 = vsel %vm746_vm8, %v744_v6, %v722_v15  ;;  %v748_v17 = vsel %vm746_vm8, %v745_v22, %v723_v16 }
 0x644   :  { %v750_v26 = vsel %vm749_vm9, %v747_v25, %v726_v1  ;;  %v751_v27 = vsel %vm749_vm9, %v748_v17, %v727_v4 }
 0x645   :  { %v753_v28 = vsel %vm752_vm10, %v750_v26, %v730_v23  ;;  %v754_v19 = vsel %vm752_vm10, %v751_v27, %v731_v24 }
 0x646   :  { %756 = vst.msk [vmem:[#allocation11] sm:$0xff] %vm755_vm11, %v753_v28 }
 0x647   :  { %757 = vst.msk [vmem:[#allocation11 + $0x8] sm:$0xff] %vm755_vm11, %v754_v19 }
 0x648   :  { %770 = dma.vmem_to_hbm [thread:$0]  %s763_s21, 256, %s765_s24, [#allocation4], %s970_s1, %s970_s1, %s971_s27  }
 0x649   :  { %957 = dma.done.wait [#allocation4], 256  }
 0x64a   :  { %958 = vsyncadd [#allocation4], 4294967040 }
 0x64b   :  { %775 = vsyncpa [#allocation4], 1 }
 0x64c   :  { %776 = vsyncpa [#allocation5], 1 }
 0x64d   :  { %777 = vsyncpa [#allocation7], 1 }
 0x64e   :  { %778 = vsyncpa [#allocation10], 1 }

</bundles_post_ra>
